<compile_context>
chip_gen: v7x
topology: tpu7x:2x2x1
jax: 0.10.0
libtpu: 0.0.40
codegen_flags: <defaults>
</compile_context>

<pallas_src>
import functools

import jax
import jax.numpy as jnp
from jax.experimental import pallas as pl
from jax.experimental.pallas import tpu as pltpu

N_LAYERS = 4


# --------------------------------------------------------------------------- #
# Kernel
# --------------------------------------------------------------------------- #
def _irm_kernel(*refs):
    """refs = (x_ref, w0_ref, ..., w{n-1}_ref, o_ref).

    Weights arrive pre-transposed to (fin_in, fin_out): each layer is a plain
    h @ Wt on the MXU with f32 accumulation; h is cast back to the weight dtype
    between layers so a bf16 weight prep keeps every matmul on the bf16 MXU
    fast path. No transposes / stray upcasts in the body.
    """
    x_ref, *w_refs, o_ref = refs
    compute_dtype = w_refs[0].dtype
    h = x_ref[...].astype(compute_dtype)
    n = len(w_refs)
    for i, w_ref in enumerate(w_refs):
        h = jnp.dot(h, w_ref[...], preferred_element_type=jnp.float32)
        if i + 1 < n:  # keep operands in the MXU fast-path dtype between layers
            h = h.astype(compute_dtype)
    o_ref[...] = h.astype(o_ref.dtype)


# --------------------------------------------------------------------------- #
# Wrapper helpers
# --------------------------------------------------------------------------- #
def prepare_weights(weights, *, mode="chained", dtype=None):
    """One-time weight preparation (do NOT call per forward).

    weights: tuple of (fin, fin) arrays in PyTorch (out, in) layout.
    mode:
      "chained"  -> one transposed operand per layer (training path).
      "pairwise" -> adjacent layers pre-multiplied (2 matmuls instead of 4).
      "fused"    -> single effective matrix (eval path / compressed_block).
    dtype: optional MXU operand dtype for the prepared weights (e.g. bf16).
    """
    assert mode in ("chained", "pairwise", "fused")
    wt = [w.astype(jnp.float32).T for w in weights]   # (in, out) layout
    if mode == "fused":
        eff = wt[0]
        for w in wt[1:]:
            eff = eff @ w
        ops = [eff]
    elif mode == "pairwise":
        ops, i = [], 0
        while i < len(wt):
            if i + 1 < len(wt):
                ops.append(wt[i] @ wt[i + 1])
                i += 2
            else:
                ops.append(wt[i])
                i += 1
    else:
        ops = wt
    out_dtype = dtype if dtype is not None else weights[0].dtype
    return tuple(op.astype(out_dtype) for op in ops)


def _vmem_ceiling_bytes():
    """Per-generation VMEM ceiling (physical capacity minus headroom)."""
    cap = 64 << 20  # conservative default (v7x per-TC VMEM)
    try:
        info = pltpu.get_tpu_info()
        cap = int(getattr(info, "vmem_capacity_bytes", cap)) or cap
    except Exception:
        pass
    # ~112 MiB on v5e/v6e (128 MiB physical), ~56 MiB on v7x (64 MiB physical).
    return max(32 << 20, min(cap - (8 << 20), int(cap * 0.875)))


def _weight_spec(fin, single_buffer):
    # The weight block index never changes across the grid, so one VMEM buffer
    # suffices; Buffered(1) halves the resident-weight footprint (matters most
    # on v7x's 64 MiB VMEM).
    if single_buffer:
        try:
            return pl.BlockSpec((fin, fin), lambda i: (0, 0),
                                pipeline_mode=pl.Buffered(1))
        except Exception:
            pass
    return pl.BlockSpec((fin, fin), lambda i: (0, 0))


@functools.partial(jax.jit, static_argnames=("block_b", "single_buffer_weights"))
def irm_linear(x, prepared_weights, *, block_b=512, single_buffer_weights=True):
    """x: (B, fin); prepared_weights: output of prepare_weights()."""
    n_w = len(prepared_weights)
    assert 1 <= n_w <= N_LAYERS
    B, fin = x.shape
    for w in prepared_weights:
        assert w.shape == (fin, fin), "IRMLinear uses square fin x fin layers"

    # ---- batch tiling -----------------------------------------------------
    bb = min(block_b, B)
    if bb < B:
        bb = max(8, (bb // 8) * 8)
    # Give the grid >= 2 steps whenever the batch allows it, so 2-TC chips
    # (v7x / megacore) shard the "parallel" batch axis across both cores.
    if B >= 16 and pl.cdiv(B, bb) < 2:
        bb = ((pl.cdiv(B, 2) + 7) // 8) * 8
    grid = (pl.cdiv(B, bb),)

    # ---- VMEM budget (explicit, fail fast) ---------------------------------
    x_item = jnp.dtype(x.dtype).itemsize
    w_item = jnp.dtype(prepared_weights[0].dtype).itemsize
    w_bufs = 1 if single_buffer_weights else 2
    w_bytes = n_w * fin * fin * w_item * w_bufs        # resident weights
    io_bytes = 2 * 2 * bb * fin * x_item               # double-buffered x / out
    interm_bytes = bb * fin * 4                        # f32 intermediate h
    need = w_bytes + io_bytes + interm_bytes + (4 << 20)  # + compiler scratch
    ceiling = _vmem_ceiling_bytes()
    if need > ceiling:
        # TODO(synk): K-tile the resident weights along an 'arbitrary' grid axis
        # once fin grows past what single-buffered (bf16) weights fit in VMEM.
        raise ValueError(
            f"IRMLinear resident weights/tiles need ~{need >> 20} MiB VMEM but "
            f"the ceiling is {ceiling >> 20} MiB; reduce fin/block_b or K-tile.")
    vmem_limit = int(min(max(need, 32 << 20), ceiling))

    x_spec = pl.BlockSpec((bb, fin), lambda i: (i, 0))
    o_spec = pl.BlockSpec((bb, fin), lambda i: (i, 0))
    w_spec = _weight_spec(fin, single_buffer_weights)

    flops = 2 * n_w * B * fin * fin
    bytes_accessed = n_w * fin * fin * w_item + 2 * B * fin * x_item
    cost = pl.CostEstimate(flops=flops, transcendentals=0,
                           bytes_accessed=bytes_accessed)

    return pl.pallas_call(
        _irm_kernel,
        out_shape=jax.ShapeDtypeStruct((B, fin), x.dtype),
        grid_spec=pltpu.PrefetchScalarGridSpec(
            num_scalar_prefetch=0,
            grid=grid,
            in_specs=[x_spec] + [w_spec] * n_w,
            out_specs=o_spec,
        ),
        compiler_params=pltpu.CompilerParams(
            dimension_semantics=("parallel",),
            vmem_limit_bytes=vmem_limit,
        ),
        cost_estimate=cost,
    )(x, *prepared_weights)


def _run(x, prepared, **kw):
    """Execute the kernel; fall back to double-buffered weights if the
    installed jax/Mosaic rejects Buffered(1) on resident blocks."""
    try:
        return jax.block_until_ready(irm_linear(x, prepared, **kw))
    except Exception:
        kw = dict(kw, single_buffer_weights=False)
        return jax.block_until_ready(irm_linear(x, prepared, **kw))


def reference(x, weights):
    h = x.astype(jnp.float32)
    for w in weights:
        h = h @ w.astype(jnp.float32).T
    return h.astype(x.dtype)


# --------------------------------------------------------------------------- #
# Self-test
# --------------------------------------------------------------------------- #
if __name__ == "__main__":
    key = jax.random.PRNGKey(0)
    B, FIN = 256, 128  # small shapes; fin on the lane axis (multiple of 128)

    kx, *kws = jax.random.split(key, 1 + N_LAYERS)
    x = jax.random.normal(kx, (B, FIN), dtype=jnp.float32)

    # Deterministic init mimicking nn.Linear's default U(-1/sqrt(fin), 1/sqrt(fin)).
    bound = 1.0 / (FIN ** 0.5)
    weights = tuple(
        jax.random.uniform(k, (FIN, FIN), dtype=jnp.float32,
                           minval=-bound, maxval=bound)
        for k in kws
    )

    ref = reference(x, weights)

    # Training path: one matmul per layer (== self.block(x)).
    wts = jax.block_until_ready(prepare_weights(weights, mode="chained"))
    out_chain = _run(x, wts)
    assert out_chain.shape == (B, FIN)
    assert jnp.allclose(out_chain, ref, atol=1e-4, rtol=1e-4), "chained mismatch"

    # Eval path: pre-multiplied effective weight (== compressed_block).
    weff = jax.block_until_ready(prepare_weights(weights, mode="fused"))
    out_fused = _run(x, weff)
    assert out_fused.shape == (B, FIN)
    assert jnp.allclose(out_fused, ref, atol=1e-3, rtol=1e-3), "fused mismatch"

    # Pairwise pre-multiplied variant (2 matmuls; helps v6e/v7x's 256x256 MXU).
    wpair = jax.block_until_ready(prepare_weights(weights, mode="pairwise"))
    out_pair = _run(x, wpair)
    assert jnp.allclose(out_pair, ref, atol=1e-3, rtol=1e-3), "pairwise mismatch"

    # bf16 MXU operands with f32 accumulation (the fast MXU path on every gen).
    x_bf = x.astype(jnp.bfloat16)
    wts_bf = jax.block_until_ready(
        prepare_weights(weights, mode="chained", dtype=jnp.bfloat16))
    out_bf = _run(x_bf, wts_bf)
    ref_bf = reference(x_bf, weights).astype(jnp.float32)
    assert jnp.allclose(out_bf.astype(jnp.float32), ref_bf,
                        atol=5e-2, rtol=5e-2), "bf16 mismatch"

    print("KERNEL_OK")
</pallas_src>

<mosaic_0001>
module attributes {stable_mosaic.version = 11 : i64} {
  func.func @_irm_kernel(%arg0: i32, %arg1: memref<128x128xf32, #tpu.memory_space<vmem>>, %arg2: memref<128x128xf32, #tpu.memory_space<vmem>>, %arg3: memref<128x128xf32, #tpu.memory_space<vmem>>, %arg4: memref<128x128xf32, #tpu.memory_space<vmem>>, %arg5: memref<128x128xf32, #tpu.memory_space<vmem>>, %arg6: memref<128x128xf32, #tpu.memory_space<vmem>>) attributes {dimension_semantics = [#tpu.dimension_semantics<parallel>], iteration_bounds = array<i64: 2>, scalar_prefetch = 0 : i64, scratch_operands = 0 : i64, tpu.core_type = #tpu.core_type<tc>, window_params = [{transform_indices = @transform_0, window_bounds = array<i64: 128, 128>}, {pipeline_mode = #tpu.pipeline_mode<synchronous>, transform_indices = @transform_1, window_bounds = array<i64: 128, 128>}, {pipeline_mode = #tpu.pipeline_mode<synchronous>, transform_indices = @transform_2, window_bounds = array<i64: 128, 128>}, {pipeline_mode = #tpu.pipeline_mode<synchronous>, transform_indices = @transform_3, window_bounds = array<i64: 128, 128>}, {pipeline_mode = #tpu.pipeline_mode<synchronous>, transform_indices = @transform_4, window_bounds = array<i64: 128, 128>}, {transform_indices = @transform_5, window_bounds = array<i64: 128, 128>}]} {
    %c0 = arith.constant 0 : index
    %c0_0 = arith.constant 0 : index
    %0 = vector.load %arg1[%c0, %c0_0] : memref<128x128xf32, #tpu.memory_space<vmem>>, vector<128x128xf32>
    %c0_1 = arith.constant 0 : index
    %c0_2 = arith.constant 0 : index
    %1 = vector.load %arg2[%c0_1, %c0_2] : memref<128x128xf32, #tpu.memory_space<vmem>>, vector<128x128xf32>
    %cst = arith.constant dense<0.000000e+00> : vector<128x128xf32>
    %2 = tpu.matmul %0, %1, %cst {dimension_numbers = #tpu.dot_dimension_numbers<[1], [0], [0], [1], [0, 0, 1, 1], [], []>} : vector<128x128xf32>, vector<128x128xf32>, vector<128x128xf32> -> vector<128x128xf32>
    %c0_3 = arith.constant 0 : index
    %c0_4 = arith.constant 0 : index
    %3 = vector.load %arg3[%c0_3, %c0_4] : memref<128x128xf32, #tpu.memory_space<vmem>>, vector<128x128xf32>
    %cst_5 = arith.constant dense<0.000000e+00> : vector<128x128xf32>
    %4 = tpu.matmul %2, %3, %cst_5 {dimension_numbers = #tpu.dot_dimension_numbers<[1], [0], [0], [1], [0, 0, 1, 1], [], []>} : vector<128x128xf32>, vector<128x128xf32>, vector<128x128xf32> -> vector<128x128xf32>
    %c0_6 = arith.constant 0 : index
    %c0_7 = arith.constant 0 : index
    %5 = vector.load %arg4[%c0_6, %c0_7] : memref<128x128xf32, #tpu.memory_space<vmem>>, vector<128x128xf32>
    %cst_8 = arith.constant dense<0.000000e+00> : vector<128x128xf32>
    %6 = tpu.matmul %4, %5, %cst_8 {dimension_numbers = #tpu.dot_dimension_numbers<[1], [0], [0], [1], [0, 0, 1, 1], [], []>} : vector<128x128xf32>, vector<128x128xf32>, vector<128x128xf32> -> vector<128x128xf32>
    %c0_9 = arith.constant 0 : index
    %c0_10 = arith.constant 0 : index
    %7 = vector.load %arg5[%c0_9, %c0_10] : memref<128x128xf32, #tpu.memory_space<vmem>>, vector<128x128xf32>
    %cst_11 = arith.constant dense<0.000000e+00> : vector<128x128xf32>
    %8 = tpu.matmul %6, %7, %cst_11 {dimension_numbers = #tpu.dot_dimension_numbers<[1], [0], [0], [1], [0, 0, 1, 1], [], []>} : vector<128x128xf32>, vector<128x128xf32>, vector<128x128xf32> -> vector<128x128xf32>
    %c0_12 = arith.constant 0 : index
    %c0_13 = arith.constant 0 : index
    %9 = vector.load %arg6[%c0_12, %c0_13] : memref<128x128xf32, #tpu.memory_space<vmem>>, vector<128x128xf32>
    tpu.vector_store %arg6[%c0_12, %c0_13], %8 {strides = array<i32>} : memref<128x128xf32, #tpu.memory_space<vmem>>, vector<128x128xf32>,
    return
  }
  func.func @transform_0(%arg0: i32) -> (i32, i32) {
    %c0_i32 = arith.constant 0 : i32
    %c0_i32_0 = arith.constant 0 : i32
    return %arg0, %c0_i32 : i32, i32
  }
  func.func @transform_1(%arg0: i32) -> (i32, i32) {
    %c0_i32 = arith.constant 0 : i32
    %c0_i32_0 = arith.constant 0 : i32
    %c0_i32_1 = arith.constant 0 : i32
    return %c0_i32, %c0_i32_0 : i32, i32
  }
  func.func @transform_2(%arg0: i32) -> (i32, i32) {
    %c0_i32 = arith.constant 0 : i32
    %c0_i32_0 = arith.constant 0 : i32
    %c0_i32_1 = arith.constant 0 : i32
    return %c0_i32, %c0_i32_0 : i32, i32
  }
  func.func @transform_3(%arg0: i32) -> (i32, i32) {
    %c0_i32 = arith.constant 0 : i32
    %c0_i32_0 = arith.constant 0 : i32
    %c0_i32_1 = arith.constant 0 : i32
    return %c0_i32, %c0_i32_0 : i32, i32
  }
  func.func @transform_4(%arg0: i32) -> (i32, i32) {
    %c0_i32 = arith.constant 0 : i32
    %c0_i32_0 = arith.constant 0 : i32
    %c0_i32_1 = arith.constant 0 : i32
    return %c0_i32, %c0_i32_0 : i32, i32
  }
  func.func @transform_5(%arg0: i32) -> (i32, i32) {
    %c0_i32 = arith.constant 0 : i32
    %c0_i32_0 = arith.constant 0 : i32
    return %arg0, %c0_i32 : i32, i32
  }
}

module attributes {stable_mosaic.version = 11 : i64} {
  func.func @_irm_kernel(%arg0: i32, %arg1: memref<128x128xf32, #tpu.memory_space<vmem>>, %arg2: memref<128x128xf32, #tpu.memory_space<vmem>>, %arg3: memref<128x128xf32, #tpu.memory_space<vmem>>, %arg4: memref<128x128xf32, #tpu.memory_space<vmem>>, %arg5: memref<128x128xf32, #tpu.memory_space<vmem>>, %arg6: memref<128x128xf32, #tpu.memory_space<vmem>>) attributes {dimension_semantics = [#tpu.dimension_semantics<parallel>], iteration_bounds = array<i64: 2>, scalar_prefetch = 0 : i64, scratch_operands = 0 : i64, tpu.core_type = #tpu.core_type<tc>, window_params = [{transform_indices = @transform_0, window_bounds = array<i64: 128, 128>}, {pipeline_mode = #tpu.pipeline_mode<synchronous>, transform_indices = @transform_1, window_bounds = array<i64: 128, 128>}, {pipeline_mode = #tpu.pipeline_mode<synchronous>, transform_indices = @transform_2, window_bounds = array<i64: 128, 128>}, {pipeline_mode = #tpu.pipeline_mode<synchronous>, transform_indices = @transform_3, window_bounds = array<i64: 128, 128>}, {pipeline_mode = #tpu.pipeline_mode<synchronous>, transform_indices = @transform_4, window_bounds = array<i64: 128, 128>}, {transform_indices = @transform_5, window_bounds = array<i64: 128, 128>}]} {
    %c0 = arith.constant 0 : index
    %c0_0 = arith.constant 0 : index
    %0 = vector.load %arg1[%c0, %c0_0] : memref<128x128xf32, #tpu.memory_space<vmem>>, vector<128x128xf32>
    %c0_1 = arith.constant 0 : index
    %c0_2 = arith.constant 0 : index
    %1 = vector.load %arg2[%c0_1, %c0_2] : memref<128x128xf32, #tpu.memory_space<vmem>>, vector<128x128xf32>
    %cst = arith.constant dense<0.000000e+00> : vector<128x128xf32>
    %2 = tpu.matmul %0, %1, %cst {dimension_numbers = #tpu.dot_dimension_numbers<[1], [0], [0], [1], [0, 0, 1, 1], [], []>} : vector<128x128xf32>, vector<128x128xf32>, vector<128x128xf32> -> vector<128x128xf32>
    %c0_3 = arith.constant 0 : index
    %c0_4 = arith.constant 0 : index
    %3 = vector.load %arg3[%c0_3, %c0_4] : memref<128x128xf32, #tpu.memory_space<vmem>>, vector<128x128xf32>
    %cst_5 = arith.constant dense<0.000000e+00> : vector<128x128xf32>
    %4 = tpu.matmul %2, %3, %cst_5 {dimension_numbers = #tpu.dot_dimension_numbers<[1], [0], [0], [1], [0, 0, 1, 1], [], []>} : vector<128x128xf32>, vector<128x128xf32>, vector<128x128xf32> -> vector<128x128xf32>
    %c0_6 = arith.constant 0 : index
    %c0_7 = arith.constant 0 : index
    %5 = vector.load %arg4[%c0_6, %c0_7] : memref<128x128xf32, #tpu.memory_space<vmem>>, vector<128x128xf32>
    %cst_8 = arith.constant dense<0.000000e+00> : vector<128x128xf32>
    %6 = tpu.matmul %4, %5, %cst_8 {dimension_numbers = #tpu.dot_dimension_numbers<[1], [0], [0], [1], [0, 0, 1, 1], [], []>} : vector<128x128xf32>, vector<128x128xf32>, vector<128x128xf32> -> vector<128x128xf32>
    %c0_9 = arith.constant 0 : index
    %c0_10 = arith.constant 0 : index
    %7 = vector.load %arg5[%c0_9, %c0_10] : memref<128x128xf32, #tpu.memory_space<vmem>>, vector<128x128xf32>
    %cst_11 = arith.constant dense<0.000000e+00> : vector<128x128xf32>
    %8 = tpu.matmul %6, %7, %cst_11 {dimension_numbers = #tpu.dot_dimension_numbers<[1], [0], [0], [1], [0, 0, 1, 1], [], []>} : vector<128x128xf32>, vector<128x128xf32>, vector<128x128xf32> -> vector<128x128xf32>
    %c0_12 = arith.constant 0 : index
    %c0_13 = arith.constant 0 : index
    %9 = vector.load %arg6[%c0_12, %c0_13] : memref<128x128xf32, #tpu.memory_space<vmem>>, vector<128x128xf32>
    tpu.vector_store %arg6[%c0_12, %c0_13], %8 {strides = array<i32>} : memref<128x128xf32, #tpu.memory_space<vmem>>, vector<128x128xf32>,
    return
  }
  func.func @transform_0(%arg0: i32) -> (i32, i32) {
    %c0_i32 = arith.constant 0 : i32
    %c0_i32_0 = arith.constant 0 : i32
    return %arg0, %c0_i32 : i32, i32
  }
  func.func @transform_1(%arg0: i32) -> (i32, i32) {
    %c0_i32 = arith.constant 0 : i32
    %c0_i32_0 = arith.constant 0 : i32
    %c0_i32_1 = arith.constant 0 : i32
    return %c0_i32, %c0_i32_0 : i32, i32
  }
  func.func @transform_2(%arg0: i32) -> (i32, i32) {
    %c0_i32 = arith.constant 0 : i32
    %c0_i32_0 = arith.constant 0 : i32
    %c0_i32_1 = arith.constant 0 : i32
    return %c0_i32, %c0_i32_0 : i32, i32
  }
  func.func @transform_3(%arg0: i32) -> (i32, i32) {
    %c0_i32 = arith.constant 0 : i32
    %c0_i32_0 = arith.constant 0 : i32
    %c0_i32_1 = arith.constant 0 : i32
    return %c0_i32, %c0_i32_0 : i32, i32
  }
  func.func @transform_4(%arg0: i32) -> (i32, i32) {
    %c0_i32 = arith.constant 0 : i32
    %c0_i32_0 = arith.constant 0 : i32
    %c0_i32_1 = arith.constant 0 : i32
    return %c0_i32, %c0_i32_0 : i32, i32
  }
  func.func @transform_5(%arg0: i32) -> (i32, i32) {
    %c0_i32 = arith.constant 0 : i32
    %c0_i32_0 = arith.constant 0 : i32
    return %arg0, %c0_i32 : i32, i32
  }
}

</mosaic_0001>

<bundles_post_ra>
// kernel: irm_linear.1
= control target key start
LH: loop header
LB: loop body
LE: loop exit
PB: predicated region body
PF: predicated region fallthrough
CT: control target
= control target key end

     0   :  { %10 = vsyncpa [#allocation3], 0  ;;  %s2290_s0 = inlined_call_operand.hbm [shape: f32[256,128], index: 0, kind: input, shape index: {}]   ;;  %s2291_s1 = inlined_call_operand.hbm [shape: f32[128,128], index: 1, kind: input, shape index: {}]   ;;  %s2292_s2 = inlined_call_operand.hbm [shape: f32[128,128], index: 2, kind: input, shape index: {}]   ;;  %s2293_s3 = inlined_call_operand.hbm [shape: f32[128,128], index: 3, kind: input, shape index: {}]   ;;  %s2294_s4 = inlined_call_operand.hbm [shape: f32[128,128], index: 4, kind: input, shape index: {}]   ;;  %s2295_s5 = inlined_call_operand.hbm [shape: f32[256,128], index: 5, kind: output, shape index: {}]  }
   0x1   :  { %12 = vsyncpa [#allocation3 + $0x1], 0 }
   0x2   :  { %13 = vsyncpa [#allocation6], 0 }
   0x3   :  { %14 = vsyncpa [#allocation9], 0 }
   0x4   :  { %15 = vsyncpa [#allocation4], 0 }
   0x5   :  { %17 = vsyncpa [#allocation4 + $0x1], 0  ;;  %s1957_s18 = smov 0   ;;  %s1959_s19 = smov 0  }
   0x6   :  { %s1961_s20 = smov 0   ;;  %s1963_s21 = smov 0  }
   0x7 LB: > { %s1978_s22 = sadd.s32 4294967295, %s1915_s21   ;;  %s1104_s23 = sadd.s32 4294967294, %s1915_s21   ;;  %s1915_s21 = sphi %s1963_s21, %s2318_s21   ;;  %s1911_s20 = sphi %s1961_s20, %s2317_s20   ;;  %s1907_s19 = sphi %s1959_s19, %s2316_s19   ;;  %s1903_s18 = sphi %s1957_s18, %s2315_s18  }
   0x8   : > { %p43_p0 = scmp.ne.s32.totalorder %s1907_s19, %s1903_s18  ;;  %p2296_p1 = scmp.eq.s32.totalorder %s1978_s22, 0 }
   0x9   : > { %p157_p3 = scmp.eq.s32.totalorder %s1104_s23, 1  ;;  %p1105_p5 = scmp.ge.s32.totalorder %s1915_s21, 1 }
   0xa   : > { %p1987_p4 = por %p2296_p1, %p43_p0  ;;  %p164_p7 = scmp.lt.s32.totalorder %s1915_s21, 3 }
   0xb   : > { %p1992_p6 = por %p157_p3, %p43_p0  ;;  %s1917_s27 = smov [#allocation5]  }
   0xc   : > { %s2299_s24 = scalar_select %p1987_p4, 1, 0 }
   0xd   : > { %s2300_s25 = scalar_select %p1992_p6, 1, 0 }
   0xe   : > { %p1997_p8 = pnand %p1105_p5, %p164_p7  ;;  %s176_s28 = sshll.u32 %s1917_s27, 4  ;;  %s2001_s28 = int_to_ptr.vmem [resolvable:$true] %s176_s28 }
   0xf   : > { %s1918_s30 = smov [#allocation8]   ;;  %s1919_s7 = smov [#allocation7]  }
  0x10   : > { %s2301_s26 = scalar_select %p1997_p8, 1, 0 }
  0x11   : > { %p1628_p9 = pneg %p1997_p8  ;;  %s202_s6 = sshll.u32 %s1918_s30, 4  ;;  %s2012_s6 = int_to_ptr.vmem [resolvable:$true] %s202_s6 }
  0x12   : > { %s2014_s8 = sshll.u32 %s1919_s7, 4  ;;  %s1699_s11 = scalar_lea.hbm %s2291_s1, 2048  ;;  %s190_s8 = int_to_ptr.vmem [resolvable:$true] %s2014_s8 }
  0x13   : > { %p2008_p11 = pnand %p1628_p9, %p2296_p1  ;;  %p1700_p12 = scmp.ne.s32.totalorder %s2291_s1, %s1699_s11 }
  0x14   : > { %p1706_p5 = scmp.lt.u32.totalorder %s1699_s11, %s2291_s1 }
  0x15   : > { %p2024_p13 = pneg %p2008_p11 }
  0x17   : > { %p1702_p0 = pnand %p2024_p13, %p1700_p12 }
  0x19   : > { %p1703_p3 = pneg %p1702_p0 }
  0x1b   : > { %p1708_p7 = pnand %p1706_p5, %p1703_p3 }
  0x1d   : > { %1711 = shalt.err (!%p1708_p7)
}
  0x1e   : > { %s1712_s17 = scalar_lea.vmem %s2001_s28, 2048  ;;  %p1720_p2 = scmp.lt.s32.totalorder %s2001_s28, %s2001_s28 }
  0x1f   : > { %p1713_p9 = scmp.ne.s32.totalorder %s2001_s28, %s1712_s17  ;;  %p1721_p6 = scmp.lt.s32.totalorder %s1712_s17, %s1712_s17 }
  0x21   : > { %p1715_p10 = pnand %p1713_p9, %p2024_p13  ;;  %p1722_p12 = por %p1721_p6, %p1720_p2 }
  0x23   : > { %p1716_p1 = pneg %p1715_p10 }
  0x25   : > { %p1723_p0 = pnand %p1722_p12, %p1716_p1 }
  0x27   : > { %1726 = shalt.err (!%p1723_p0)
}
  0x28   : > { %s1920_s23 = smov 128   ;;  %s1921_s27 = smov 8  }
  0x29   : > { %1631 = dma.hbm_to_vmem [thread:$0]  (!%p2008_p11), %s2291_s1, 2048, %s2001_s28, [#allocation6], %s1920_s23, %s1920_s23, %s1921_s27  }
  0x2a   : > { %s1727_s11 = scalar_lea.hbm %s2293_s3, 2048 }
  0x2b   : > { %p1728_p1 = scmp.ne.s32.totalorder %s2293_s3, %s1727_s11  ;;  %p1734_p10 = scmp.lt.u32.totalorder %s1727_s11, %s2293_s3 }
  0x2d   : > { %p1730_p2 = pnand %p1728_p1, %p2024_p13 }
  0x2f   : > { %p1731_p6 = pneg %p1730_p2 }
  0x31   : > { %p1736_p3 = pnand %p1734_p10, %p1731_p6 }
  0x33   : > { %1739 = shalt.err (!%p1736_p3)
}
  0x34   : > { %s1740_s28 = scalar_lea.vmem %s2012_s6, 2048  ;;  %p1748_p12 = scmp.lt.s32.totalorder %s2012_s6, %s2012_s6 }
  0x35   : > { %p1741_p5 = scmp.ne.s32.totalorder %s2012_s6, %s1740_s28  ;;  %p1749_p0 = scmp.lt.s32.totalorder %s1740_s28, %s1740_s28 }
  0x37   : > { %p1743_p7 = pnand %p1741_p5, %p2024_p13  ;;  %p1750_p1 = por %p1749_p0, %p1748_p12 }
  0x39   : > { %p1744_p9 = pneg %p1743_p7 }
  0x3b   : > { %p1751_p2 = pnand %p1750_p1, %p1744_p9 }
  0x3d   : > { %1754 = shalt.err (!%p1751_p2)
}
  0x3e   : > { %1637 = dma.hbm_to_vmem [thread:$0]  (!%p2008_p11), %s2293_s3, 2048, %s2012_s6, [#allocation9], %s1920_s23, %s1920_s23, %s1921_s27  }
  0x3f   : > { %s1755_s10 = scalar_lea.hbm %s2292_s2, 2048 }
  0x40   : > { %p1756_p6 = scmp.ne.s32.totalorder %s2292_s2, %s1755_s10  ;;  %p1762_p5 = scmp.lt.u32.totalorder %s1755_s10, %s2292_s2 }
  0x42   : > { %p1758_p10 = pnand %p1756_p6, %p2024_p13 }
  0x44   : > { %p1759_p3 = pneg %p1758_p10 }
  0x46   : > { %p1764_p7 = pnand %p1762_p5, %p1759_p3 }
  0x48   : > { %1767 = shalt.err (!%p1764_p7)
}
  0x49   : > { %s1768_s16 = scalar_lea.vmem %s190_s8, 2048  ;;  %p1776_p1 = scmp.lt.s32.totalorder %s190_s8, %s190_s8 }
  0x4a   : > { %p1769_p9 = scmp.ne.s32.totalorder %s190_s8, %s1768_s16  ;;  %p1777_p2 = scmp.lt.s32.totalorder %s1768_s16, %s1768_s16 }
  0x4c   : > { %p1771_p12 = pnand %p1769_p9, %p2024_p13  ;;  %p1778_p4 = por %p1777_p2, %p1776_p1 }
  0x4e   : > { %p1772_p0 = pneg %p1771_p12 }
  0x50   : > { %p1779_p8 = pnand %p1778_p4, %p1772_p0 }
  0x52   : > { %1782 = shalt.err (!%p1779_p8)
}
  0x53   : > { %1634 = dma.hbm_to_vmem [thread:$0]  (!%p2008_p11), %s2292_s2, 2048, %s190_s8, [#allocation6], %s1920_s23, %s1920_s23, %s1921_s27  }
  0x54   : > { %s1922_s17 = smov [#allocation10]   ;;  %s1783_s10 = scalar_lea.hbm %s2294_s4, 2048 }
  0x55   : > { %s215_s30 = sshll.u32 %s1922_s17, 4  ;;  %p1784_p4 = scmp.ne.s32.totalorder %s2294_s4, %s1783_s10  ;;  %s216_s30 = int_to_ptr.vmem [resolvable:$true] %s215_s30 }
  0x56   : > { %p1790_p10 = scmp.lt.u32.totalorder %s1783_s10, %s2294_s4 }
  0x57   : > { %p1786_p8 = pnand %p1784_p4, %p2024_p13 }
  0x59   : > { %p1787_p6 = pneg %p1786_p8 }
  0x5b   : > { %p1792_p3 = pnand %p1790_p10, %p1787_p6 }
  0x5d   : > { %1795 = shalt.err (!%p1792_p3)
}
  0x5e   : > { %s1796_s8 = scalar_lea.vmem %s216_s30, 2048  ;;  %p1804_p12 = scmp.lt.s32.totalorder %s216_s30, %s216_s30 }
  0x5f   : > { %p1797_p5 = scmp.ne.s32.totalorder %s216_s30, %s1796_s8  ;;  %p1805_p0 = scmp.lt.s32.totalorder %s1796_s8, %s1796_s8 }
  0x61   : > { %p1799_p7 = pnand %p1797_p5, %p2024_p13  ;;  %p1806_p1 = por %p1805_p0, %p1804_p12 }
  0x63   : > { %p1800_p9 = pneg %p1799_p7 }
  0x65   : > { %p1807_p2 = pnand %p1806_p1, %p1800_p9 }
  0x67   : > { %1810 = shalt.err (!%p1807_p2)
}
  0x68   : > { %1640 = dma.hbm_to_vmem [thread:$0]  (!%p2008_p11), %s2294_s4, 2048, %s216_s30, [#allocation9], %s1920_s23, %s1920_s23, %s1921_s27  }
  0x69   : > { %s2118_s14 = sadd.s32 1, %s1915_s21   ;;  %s30_s29 = sadd.s32 1, %s1911_s20 }
  0x6a   : > { %s27_s28 = ssub.s32 %s1915_s21, %s2118_s14  ;;  %p37_p13 = scmp.ne.s32.totalorder %s1911_s20, %s1907_s19 }
  0x6b   : > { %p28_p4 = scmp.eq.s32.totalorder %s27_s28, 0  ;;  %p38_p8 = scmp.eq.s32.totalorder %s1915_s21, 0 }
  0x6c   : > { %p2304_p6 = scmp.eq.s32.totalorder %s1978_s22, 1  ;;  %p1653_p3 = scmp.lt.s32.totalorder %s1915_s21, 2 }
  0x6d   : > { %s2134_s7 = scalar_select %p28_p4, %s1911_s20, %s30_s29  }
  0x6e   : > { %p2128_p10 = por %p2304_p6, %p37_p13  ;;  %p39_p5 = por %p38_p8, %p37_p13 }
  0x6f   : > { %s229_s9 = sand.u32 1, %s1911_s20   ;;  %s1126_s30 = sshll.u32 %s1915_s21, 11 }
  0x70   : > { %s1111_s10 = sshll.u32 %s229_s9, 7  ;;  %s2141_s13 = scalar_lea.hbm %s2290_s0, %s1126_s30 }
  0x71   : > { %s233_s15 = scalar_lea.vmem [#allocation2], %s1111_s10  ;;  %p2145_p11 = pnand %p1653_p3, %p39_p5 }
  0x72   : > { %s240_s8 = sshll.u32 %s233_s15, 4  ;;  %s2149_s6 = scalar_lea.sflag [#allocation3], %s229_s9  ;;  %s2143_s8 = int_to_ptr.vmem [resolvable:$true] %s240_s8 }
  0x73   : > { %s1811_s29 = scalar_lea.hbm %s2141_s13, 2048  ;;  %p1813_p9 = pneg %p2145_p11 }
  0x74   : > { %p1812_p7 = scmp.ne.s32.totalorder %s2141_s13, %s1811_s29  ;;  %s1816_s30 = scalar_lea.hbm %s2290_s0, 4096 }
  0x75   : > { %p1817_p1 = scmp.lt.u32.totalorder %s2141_s13, %s2290_s0  ;;  %p1818_p2 = scmp.lt.u32.totalorder %s1816_s30, %s1811_s29 }
  0x76   : > { %p1814_p12 = pnand %p1813_p9, %p1812_p7  ;;  %p1820_p4 = scmp.lt.u32.totalorder %s1811_s29, %s2141_s13 }
  0x77   : > { %p1819_p13 = por %p1818_p2, %p1817_p1 }
  0x78   : > { %p1815_p0 = pneg %p1814_p12 }
  0x79   : > { %p1821_p8 = por %p1820_p4, %p1819_p13 }
  0x7b   : > { %p1822_p6 = pnand %p1821_p8, %p1815_p0 }
  0x7d   : > { %1825 = shalt.err (!%p1822_p6)
}
  0x7e   : > { %s1826_s9 = scalar_lea.vmem %s2143_s8, 2048  ;;  %s1923_s15 = smov [#allocation2]  }
  0x7f   : > { %p1827_p3 = scmp.ne.s32.totalorder %s2143_s8, %s1826_s9  ;;  %s1831_s28 = sshll.u32 %s1923_s15, 4  ;;  %s1832_s28 = int_to_ptr.vmem [resolvable:$false] %s1831_s28 }
  0x80   : > { %s1833_s10 = scalar_lea.vmem %s1832_s28, 4096  ;;  %p1834_p12 = scmp.lt.s32.totalorder %s2143_s8, %s1832_s28 }
  0x81   : > { %p1829_p5 = pnand %p1827_p3, %p1813_p9  ;;  %p1835_p1 = scmp.lt.s32.totalorder %s1833_s10, %s1826_s9 }
  0x83   : > { %p1830_p7 = pneg %p1829_p5  ;;  %p1836_p2 = por %p1835_p1, %p1834_p12 }
  0x85   : > { %p1837_p13 = pnand %p1836_p2, %p1830_p7 }
  0x87   : > { %1840 = shalt.err (!%p1837_p13)
}
  0x88   : > { %1644 = dma.hbm_to_vmem [thread:$0]  (!%p2145_p11), %s2141_s13, 2048, %s2143_s8, %s2149_s6, %s1920_s23, %s1920_s23, %s1921_s27  }
  0x89   : > { %p2307_p9 = scmp.ne.s32.totalorder %s2301_s26, 0 }
  0x8a   : > { %s2183_s29 = sand.u32 (!%p2307_p9), 1, %s1907_s19   ;;  %p2308_p0 = scmp.ne.s32.totalorder (!%p2307_p9), %s2299_s24, 0 }
  0x8b   : > { %252 = sbr.rel (%p2307_p9) target bundleno = 1087 (0x43f), region = 40  ;;  %s1115_s30 = sshll.u32 (!%p2307_p9), %s2183_s29, 7 }
  0x8c   : > { %s255_s11 = scalar_lea.sflag (!%p2307_p9), [#allocation3], %s2183_s29  ;;  %s2189_s16 = scalar_lea.vmem (!%p2307_p9), [#allocation2], %s1115_s30 }
  0x92   : > { %1886 = dma.done.wait (%p2308_p0), %s255_s11, 2048  }
  0x93   : > { %1888 = vsyncadd (%p2308_p0), %s255_s11, 4294965248  ;;  %p2309_p11 = scmp.eq.s32.totalorder %s1978_s22, 0 }
  0x95   : > { %1890 = dma.done.wait (%p2309_p11), [#allocation6], 4096   ;;  %p2310_p4 = pmov %p2309_p11 }
  0x97   : > { %1892 = vsyncadd (%p2310_p4), [#allocation6], 4294963200  ;;  %p2311_p8 = pmov %p2310_p4 }
  0x98   : > { %p2312_p6 = pmov %p2310_p4 }
  0x99   : > { %1894 = dma.done.wait (%p2311_p8), [#allocation9], 4096  }
  0x9a   : > { %1896 = vsyncadd (%p2312_p6), [#allocation9], 4294963200  ;;  %v319_v0 = vld [vmem:[#allocation5] sm:$0xff]  ;;  %v320_v1 = vld [vmem:[#allocation5 + $0x8] sm:$0xff]  ;;  %s2221_s24 = scalar_lea.vmem [#allocation11], %s1115_s30  ;;  %s1127_s26 = sshll.u32 %s1978_s22, 11 }
  0x9b   : > { %v321_v2 = vld [vmem:[#allocation5 + $0x10] sm:$0xff]  ;;  %v1480_v3 = vpack.c.bf16 %v320_v1, %v319_v0  ;;  %v322_v4 = vld [vmem:[#allocation5 + $0x18] sm:$0xff]  ;;  %v323_v6 = vld [vmem:[#allocation5 + $0x20] sm:$0xff]  ;;  %s993_s23 = sshll.u32 %s2221_s24, 4  ;;  %s2242_s8 = scalar_lea.hbm %s2295_s5, %s1127_s26  ;;  %s2244_s23 = int_to_ptr.vmem [resolvable:$true] %s993_s23 }
  0x9c   : > { %v1484_v5 = vpack.c.bf16 %v322_v4, %v321_v2  ;;  %v324_v7 = vld [vmem:[#allocation5 + $0x28] sm:$0xff]  ;;  %v303_v9 = vld [vmem:[%s2189_s16] sm:$0xff]  ;;  %v325_v10 = vld [vmem:[#allocation5 + $0x30] sm:$0xff]  ;;  %s980_s6 = scalar_lea.sflag [#allocation4], %s2183_s29  ;;  %s1841_s22 = scalar_lea.vmem %s2244_s23, 2048 }
  0x9d   : > { %1481 = vmatprep.subr.bf16.mxu0 %v1480_v3  ;;  %v1488_v8 = vpack.c.bf16 %v324_v7, %v323_v6  ;;  %v326_v11 = vld [vmem:[#allocation5 + $0x38] sm:$0xff]  ;;  %1288 = vmatprep.mubr.f32.mxu0 %v303_v9  ;;  %v327_v13 = vld [vmem:[#allocation5 + $0x40] sm:$0xff]  ;;  %v328_v14 = vld [vmem:[#allocation5 + $0x48] sm:$0xff]  ;;  %p1842_p3 = scmp.ne.s32.totalorder %s2244_s23, %s1841_s22  ;;  %s1924_s12 = smov [#allocation11]  }
  0x9e   : > { %1483 = vmatpush3.bf16.msra.mxu0 %v1480_v3  ;;  %v1492_v12 = vpack.c.bf16 %v326_v11, %v325_v10  ;;  %v480_v15 = vld [vmem:[#allocation7] sm:$0xff]  ;;  %v481_v16 = vld [vmem:[#allocation7 + $0x8] sm:$0xff]  ;;  %v482_v17 = vld [vmem:[#allocation7 + $0x10] sm:$0xff]  ;;  %v1496_v21 = vpack.c.bf16 %v328_v14, %v327_v13  ;;  %s1845_s9 = sshll.u32 %s1924_s12, 4  ;;  %s1846_s9 = int_to_ptr.vmem [resolvable:$false] %s1845_s9 }
  0x9f   : > { %1485 = vmatprep.subr.bf16.mxu0 %v1484_v5  ;;  %v483_v18 = vld [vmem:[#allocation7 + $0x18] sm:$0xff]  ;;  %v1512_v19 = vpack.c.bf16 %v481_v16, %v480_v15  ;;  %v484_v22 = vld [vmem:[#allocation7 + $0x20] sm:$0xff]  ;;  %v485_v23 = vld [vmem:[#allocation7 + $0x28] sm:$0xff]  ;;  %p1843_p5 = pnand %p1842_p3, %p2128_p10  ;;  %s1847_s15 = scalar_lea.vmem %s1846_s9, 4096 }
  0xa0   : > { %v1516_v20 = vpack.c.bf16 %v483_v18, %v482_v17  ;;  %v329_v24 = vld [vmem:[#allocation5 + $0x50] sm:$0xff]  ;;  %v330_v25 = vld [vmem:[#allocation5 + $0x58] sm:$0xff]  ;;  %v1520_v26 = vpack.c.bf16 %v485_v23, %v484_v22  ;;  %v331_v30 = vld [vmem:[#allocation5 + $0x60] sm:$0xff]  ;;  %p1848_p12 = scmp.lt.s32.totalorder %s2244_s23, %s1846_s9  ;;  %p1849_p1 = scmp.lt.s32.totalorder %s1847_s15, %s1841_s22 }
  0xa1   : > { %1513 = vmatprep.subr.bf16.mxu1 %v1512_v19  ;;  %v1500_v27 = vpack.c.bf16 %v330_v25, %v329_v24  ;;  %v486_v28 = vld [vmem:[#allocation7 + $0x30] sm:$0xff]  ;;  %v487_v29 = vld [vmem:[#allocation7 + $0x38] sm:$0xff]  ;;  %v332_v31 = vld [vmem:[#allocation5 + $0x68] sm:$0xff]  ;;  %p1844_p7 = pneg %p1843_p5 }
  0xa2   : > { %1487 = vmatpush3.bf16.msra.mxu0 %v1484_v5  ;;  %1515 = vmatpush3.bf16.msra.mxu1 %v1512_v19  ;;  %v1524_v32 = vpack.c.bf16 %v487_v29, %v486_v28  ;;  %v1504_v33 = vpack.c.bf16 %v332_v31, %v331_v30  ;;  %v488_v34 = vld [vmem:[#allocation7 + $0x40] sm:$0xff]  ;;  %v489_v35 = vld [vmem:[#allocation7 + $0x48] sm:$0xff]  ;;  %v333_v36 = vld [vmem:[#allocation5 + $0x70] sm:$0xff]  ;;  %p1850_p2 = por %p1849_p1, %p1848_p12 }
  0xa3   : > { %1489 = vmatprep.subr.bf16.mxu0 %v1488_v8  ;;  %1517 = vmatprep.subr.bf16.mxu1 %v1516_v20  ;;  %v334_v37 = vld [vmem:[#allocation5 + $0x78] sm:$0xff]  ;;  %v1528_v38 = vpack.c.bf16 %v489_v35, %v488_v34  ;;  %v490_v40 = vld [vmem:[#allocation7 + $0x50] sm:$0xff]  ;;  %v492_v43 = vld [vmem:[#allocation7 + $0x60] sm:$0xff] }
  0xa4   : > { %v1508_v39 = vpack.c.bf16 %v334_v37, %v333_v36  ;;  %v491_v41 = vld [vmem:[#allocation7 + $0x58] sm:$0xff]  ;;  %v493_v44 = vld [vmem:[#allocation7 + $0x68] sm:$0xff]  ;;  %v305_v47 = vld [vmem:[%s2189_s16 + $0x10] sm:$0xff]  ;;  %p1851_p13 = pnand %p1850_p2, %p1844_p7 }
  0xa5   : > { %v1532_v42 = vpack.c.bf16 %v491_v41, %v490_v40  ;;  %v304_v45 = vld [vmem:[%s2189_s16 + $0x8] sm:$0xff]  ;;  %v1536_v46 = vpack.c.bf16 %v493_v44, %v492_v43  ;;  %v494_v48 = vld [vmem:[#allocation7 + $0x70] sm:$0xff]  ;;  %v495_v49 = vld [vmem:[#allocation7 + $0x78] sm:$0xff] }
  0xa6   : > { %1491 = vmatpush3.bf16.msra.mxu0 %v1488_v8  ;;  %1519 = vmatpush3.bf16.msra.mxu1 %v1516_v20  ;;  %v306_v50 = vld [vmem:[%s2189_s16 + $0x18] sm:$0xff]  ;;  %v1540_v51 = vpack.c.bf16 %v495_v49, %v494_v48  ;;  %v307_v52 = vld [vmem:[%s2189_s16 + $0x20] sm:$0xff]  ;;  %v308_v53 = vld [vmem:[%s2189_s16 + $0x28] sm:$0xff] }
  0xa7   : > { %1493 = vmatprep.subr.bf16.mxu0 %v1492_v12  ;;  %1521 = vmatprep.subr.bf16.mxu1 %v1520_v26  ;;  %v309_v54 = vld [vmem:[%s2189_s16 + $0x30] sm:$0xff]  ;;  %v310_v55 = vld [vmem:[%s2189_s16 + $0x38] sm:$0xff]  ;;  %v311_v56 = vld [vmem:[%s2189_s16 + $0x40] sm:$0xff] }
  0xa8   : > { %v312_v57 = vld [vmem:[%s2189_s16 + $0x48] sm:$0xff]  ;;  %v313_v58 = vld [vmem:[%s2189_s16 + $0x50] sm:$0xff]  ;;  %v314_v59 = vld [vmem:[%s2189_s16 + $0x58] sm:$0xff] }
  0xa9   : > { %v315_v60 = vld [vmem:[%s2189_s16 + $0x60] sm:$0xff]  ;;  %v316_v61 = vld [vmem:[%s2189_s16 + $0x68] sm:$0xff]  ;;  %v317_v62 = vld [vmem:[%s2189_s16 + $0x70] sm:$0xff] }
  0xaa   : > { %1495 = vmatpush3.bf16.msra.mxu0 %v1492_v12  ;;  %1523 = vmatpush3.bf16.msra.mxu1 %v1520_v26  ;;  %v318_v63 = vld [vmem:[%s2189_s16 + $0x78] sm:$0xff]  ;;  %v641_v0 = vld [vmem:[#allocation8] sm:$0xff]  ;;  %v642_v1 = vld [vmem:[#allocation8 + $0x8] sm:$0xff] }
  0xab   : > { %1497 = vmatprep.subr.bf16.mxu0 %v1496_v21  ;;  %1525 = vmatprep.subr.bf16.mxu1 %v1524_v32  ;;  %v643_v2 = vld [vmem:[#allocation8 + $0x10] sm:$0xff]  ;;  %v1544_v3 = vpack.c.bf16 %v642_v1, %v641_v0  ;;  %v644_v4 = vld [vmem:[#allocation8 + $0x18] sm:$0xff]  ;;  %v645_v6 = vld [vmem:[#allocation8 + $0x20] sm:$0xff] }
  0xac   : > { %v1548_v5 = vpack.c.bf16 %v644_v4, %v643_v2  ;;  %v646_v7 = vld [vmem:[#allocation8 + $0x28] sm:$0xff]  ;;  %v647_v9 = vld [vmem:[#allocation8 + $0x30] sm:$0xff]  ;;  %v648_v10 = vld [vmem:[#allocation8 + $0x38] sm:$0xff] }
  0xad   : > { %v1552_v8 = vpack.c.bf16 %v646_v7, %v645_v6  ;;  %v1556_v11 = vpack.c.bf16 %v648_v10, %v647_v9  ;;  %v649_v12 = vld [vmem:[#allocation8 + $0x40] sm:$0xff]  ;;  %v650_v13 = vld [vmem:[#allocation8 + $0x48] sm:$0xff]  ;;  %v651_v15 = vld [vmem:[#allocation8 + $0x50] sm:$0xff] }
  0xae   : > { %1499 = vmatpush3.bf16.msra.mxu0 %v1496_v21  ;;  %1527 = vmatpush3.bf16.msra.mxu1 %v1524_v32  ;;  %v1560_v14 = vpack.c.bf16 %v650_v13, %v649_v12  ;;  %v652_v16 = vld [vmem:[#allocation8 + $0x58] sm:$0xff]  ;;  %v653_v18 = vld [vmem:[#allocation8 + $0x60] sm:$0xff]  ;;  %v654_v19 = vld [vmem:[#allocation8 + $0x68] sm:$0xff] }
  0xaf   : > { %1501 = vmatprep.subr.bf16.mxu0 %v1500_v27  ;;  %1529 = vmatprep.subr.bf16.mxu1 %v1528_v38  ;;  %v1564_v17 = vpack.c.bf16 %v652_v16, %v651_v15  ;;  %v1568_v20 = vpack.c.bf16 %v654_v19, %v653_v18  ;;  %v655_v21 = vld [vmem:[#allocation8 + $0x70] sm:$0xff]  ;;  %v656_v22 = vld [vmem:[#allocation8 + $0x78] sm:$0xff]  ;;  %v802_v40 = vld [vmem:[#allocation10] sm:$0xff] }
  0xb0   : > { %v1572_v23 = vpack.c.bf16 %v656_v22, %v655_v21  ;;  %v803_v41 = vld [vmem:[#allocation10 + $0x8] sm:$0xff]  ;;  %v805_v44 = vld [vmem:[#allocation10 + $0x18] sm:$0xff]  ;;  %v808_v49 = vld [vmem:[#allocation10 + $0x30] sm:$0xff] }
  0xb1   : > { %v1576_v43 = vpack.c.bf16 %v803_v41, %v802_v40 }
  0xb2   : > { %1503 = vmatpush3.bf16.msra.mxu0 %v1500_v27  ;;  %1531 = vmatpush3.bf16.msra.mxu1 %v1528_v38 }
  0xb3   : > { %1505 = vmatprep.subr.bf16.mxu0 %v1504_v33  ;;  %1533 = vmatprep.subr.bf16.mxu1 %v1532_v42 }
  0xb6   : > { %1507 = vmatpush3.bf16.msra.mxu0 %v1504_v33  ;;  %1535 = vmatpush3.bf16.msra.mxu1 %v1532_v42  ;;  %v804_v42 = vld [vmem:[#allocation10 + $0x10] sm:$0xff] }
  0xb7   : > { %1509 = vmatprep.subr.bf16.mxu0 %v1508_v39  ;;  %1537 = vmatprep.subr.bf16.mxu1 %v1536_v46 }
  0xba   : > { %1511 = vmatpush3.bf16.msra.mxu0 %v1508_v39  ;;  %1539 = vmatpush3.bf16.msra.mxu1 %v1536_v46  ;;  %v806_v46 = vld [vmem:[#allocation10 + $0x20] sm:$0xff] }
  0xbb   : > { %1541 = vmatprep.subr.bf16.mxu1 %v1540_v51  ;;  %1545 = vmatprep.subr.bf16.mxu0 %v1544_v3 }
  0xbd   : > { %1289 = vmatmul.mubr.f32.vlgmr.msra.gmra.mrb[0].mxu0 %v304_v45  ;;  %v1580_v45 = vpack.c.bf16 %v805_v44, %v804_v42 }
  0xbe   : > { %1291 = vmatprep.mubr.f32.mxu0 %v305_v47  ;;  %1543 = vmatpush3.bf16.msra.mxu1 %v1540_v51  ;;  %v807_v47 = vld [vmem:[#allocation10 + $0x28] sm:$0xff] }
  0xbf   : > { %1547 = vmatpush3.bf16.msra.mxu0 %v1544_v3  ;;  %1577 = vmatprep.subr.bf16.mxu1 %v1576_v43  ;;  %v1584_v48 = vpack.c.bf16 %v807_v47, %v806_v46 }
  0xc0   : > { %1549 = vmatprep.subr.bf16.mxu0 %v1548_v5 }
  0xc1   : > { %1292 = vmatmul.mubr.f32.gmra.mrb[2].mxu0 %v306_v50  ;;  %v809_v50 = vld [vmem:[#allocation10 + $0x38] sm:$0xff] }
  0xc2   : > { %1294 = vmatprep.mubr.f32.mxu0 %v307_v52  ;;  %v1588_v51 = vpack.c.bf16 %v809_v50, %v808_v49  ;;  %v810_v52 = vld [vmem:[#allocation10 + $0x40] sm:$0xff] }
  0xc3   : > { %1551 = vmatpush3.bf16.msra.mxu0 %v1548_v5 }
  0xc4   : > { %1553 = vmatprep.subr.bf16.mxu0 %v1552_v8 }
  0xc5   : > { %1295 = vmatmul.mubr.f32.gmra.mrb[4].mxu0 %v308_v53  ;;  %v811_v53 = vld [vmem:[#allocation10 + $0x48] sm:$0xff] }
  0xc6   : > { %1297 = vmatprep.mubr.f32.mxu0 %v309_v54  ;;  %v1592_v54 = vpack.c.bf16 %v811_v53, %v810_v52 }
  0xc7   : > { %1555 = vmatpush3.bf16.msra.mxu0 %v1552_v8 }
  0xc8   : > { %1557 = vmatprep.subr.bf16.mxu0 %v1556_v11 }
  0xc9   : > { %1298 = vmatmul.mubr.f32.gmra.mrb[6].mxu0 %v310_v55  ;;  %v812_v55 = vld [vmem:[#allocation10 + $0x50] sm:$0xff] }
  0xca   : > { %1300 = vmatprep.mubr.f32.mxu0 %v311_v56  ;;  %v813_v56 = vld [vmem:[#allocation10 + $0x58] sm:$0xff] }
  0xcb   : > { %1559 = vmatpush3.bf16.msra.mxu0 %v1556_v11 }
  0xcc   : > { %1561 = vmatprep.subr.bf16.mxu0 %v1560_v14 }
  0xcd   : > { %1301 = vmatmul.mubr.f32.gmra.mrb[8].mxu0 %v312_v57  ;;  %v1596_v57 = vpack.c.bf16 %v813_v56, %v812_v55 }
  0xce   : > { %1303 = vmatprep.mubr.f32.mxu0 %v313_v58  ;;  %v814_v58 = vld [vmem:[#allocation10 + $0x60] sm:$0xff] }
  0xcf   : > { %1563 = vmatpush3.bf16.msra.mxu0 %v1560_v14 }
  0xd0   : > { %1565 = vmatprep.subr.bf16.mxu0 %v1564_v17 }
  0xd1   : > { %1304 = vmatmul.mubr.f32.gmra.mrb[10].mxu0 %v314_v59  ;;  %v815_v59 = vld [vmem:[#allocation10 + $0x68] sm:$0xff] }
  0xd2   : > { %1306 = vmatprep.mubr.f32.mxu0 %v315_v60  ;;  %v1600_v60 = vpack.c.bf16 %v815_v59, %v814_v58 }
  0xd3   : > { %1567 = vmatpush3.bf16.msra.mxu0 %v1564_v17 }
  0xd4   : > { %1569 = vmatprep.subr.bf16.mxu0 %v1568_v20 }
  0xd5   : > { %1307 = vmatmul.mubr.f32.gmra.mrb[12].mxu0 %v316_v61  ;;  %v816_v61 = vld [vmem:[#allocation10 + $0x70] sm:$0xff] }
  0xd6   : > { %1309 = vmatprep.mubr.f32.mxu0 %v317_v62  ;;  %v817_v62 = vld [vmem:[#allocation10 + $0x78] sm:$0xff] }
  0xd7   : > { %1571 = vmatpush3.bf16.msra.mxu0 %v1568_v20 }
  0xd8   : > { %1573 = vmatprep.subr.bf16.mxu0 %v1572_v23 }
  0xd9   : > { %1310 = vmatmul.mubr.f32.gmra.mrb[14].mxu0 %v318_v63  ;;  %v1604_v63 = vpack.c.bf16 %v817_v62, %v816_v61 }
  0xdb   : > { %1575 = vmatpush3.bf16.msra.mxu0 %v1572_v23 }
 0x190   : > { %v1290_v24 = vpop.f32.mrb[0].mxu0 }
 0x191   : > { %v401_v25 = vpop.f32.mrb[1].mxu0 }
 0x192   : > { %1344 = vmatprep.mubr.f32.mxu1 %v401_v25 }
 0x193   : > { %1345 = vmatmul.mubr.f32.vlgmr.msra.gmra.mrb[0].mxu1 %v1290_v24 }
 0x194   : > { %v1293_v26 = vpop.f32.mrb[2].mxu0  ;;  %1579 = vmatpush3.bf16.msra.mxu1 %v1576_v43 }
 0x195   : > { %v411_v27 = vpop.f32.mrb[3].mxu0  ;;  %1581 = vmatprep.subr.bf16.mxu1 %v1580_v45 }
 0x196   : > { %1347 = vmatprep.mubr.f32.mxu1 %v411_v27 }
 0x197   : > { %1348 = vmatmul.mubr.f32.gmra.mrb[2].mxu1 %v1293_v26 }
 0x198   : > { %v1296_v28 = vpop.f32.mrb[4].mxu0  ;;  %1583 = vmatpush3.bf16.msra.mxu1 %v1580_v45 }
 0x199   : > { %v421_v29 = vpop.f32.mrb[5].mxu0  ;;  %1585 = vmatprep.subr.bf16.mxu1 %v1584_v48 }
 0x19a   : > { %1350 = vmatprep.mubr.f32.mxu1 %v421_v29 }
 0x19b   : > { %1351 = vmatmul.mubr.f32.gmra.mrb[4].mxu1 %v1296_v28 }
 0x19c   : > { %v1299_v30 = vpop.f32.mrb[6].mxu0  ;;  %1587 = vmatpush3.bf16.msra.mxu1 %v1584_v48 }
 0x19d   : > { %v431_v31 = vpop.f32.mrb[7].mxu0  ;;  %1589 = vmatprep.subr.bf16.mxu1 %v1588_v51 }
 0x19e   : > { %1353 = vmatprep.mubr.f32.mxu1 %v431_v31 }
 0x19f   : > { %1354 = vmatmul.mubr.f32.gmra.mrb[6].mxu1 %v1299_v30 }
 0x1a0   : > { %v1302_v32 = vpop.f32.mrb[8].mxu0  ;;  %1591 = vmatpush3.bf16.msra.mxu1 %v1588_v51 }
 0x1a1   : > { %v441_v33 = vpop.f32.mrb[9].mxu0  ;;  %1593 = vmatprep.subr.bf16.mxu1 %v1592_v54 }
 0x1a2   : > { %1356 = vmatprep.mubr.f32.mxu1 %v441_v33 }
 0x1a3   : > { %1357 = vmatmul.mubr.f32.gmra.mrb[8].mxu1 %v1302_v32 }
 0x1a4   : > { %v1305_v34 = vpop.f32.mrb[10].mxu0  ;;  %1595 = vmatpush3.bf16.msra.mxu1 %v1592_v54 }
 0x1a5   : > { %v451_v35 = vpop.f32.mrb[11].mxu0  ;;  %1597 = vmatprep.subr.bf16.mxu1 %v1596_v57 }
 0x1a6   : > { %1359 = vmatprep.mubr.f32.mxu1 %v451_v35 }
 0x1a7   : > { %1360 = vmatmul.mubr.f32.gmra.mrb[10].mxu1 %v1305_v34 }
 0x1a8   : > { %v1308_v36 = vpop.f32.mrb[12].mxu0  ;;  %1599 = vmatpush3.bf16.msra.mxu1 %v1596_v57 }
 0x1a9   : > { %v461_v37 = vpop.f32.mrb[13].mxu0  ;;  %1601 = vmatprep.subr.bf16.mxu1 %v1600_v60 }
 0x1aa   : > { %1362 = vmatprep.mubr.f32.mxu1 %v461_v37 }
 0x1ab   : > { %1363 = vmatmul.mubr.f32.gmra.mrb[12].mxu1 %v1308_v36 }
 0x1ac   : > { %v1311_v38 = vpop.f32.mrb[14].mxu0  ;;  %1603 = vmatpush3.bf16.msra.mxu1 %v1600_v60 }
 0x1ad   : > { %v471_v39 = vpop.f32.mrb[15].mxu0  ;;  %1605 = vmatprep.subr.bf16.mxu1 %v1604_v63 }
 0x1ae   : > { %1365 = vmatprep.mubr.f32.mxu1 %v471_v39 }
 0x1af   : > { %1366 = vmatmul.mubr.f32.gmra.mrb[14].mxu1 %v1311_v38 }
 0x1b0   : > { %1607 = vmatpush3.bf16.msra.mxu1 %v1604_v63 }
 0x266   : > { %v1346_v0 = vpop.f32.mrb[0].mxu1 }
 0x267   : > { %v562_v1 = vpop.f32.mrb[1].mxu1 }
 0x268   : > { %1400 = vmatprep.mubr.f32.mxu0 %v562_v1 }
 0x269   : > { %1401 = vmatmul.mubr.f32.vlgmr.msra.gmra.mrb[16].mxu0 %v1346_v0 }
 0x26a   : > { %v1349_v2 = vpop.f32.mrb[2].mxu1 }
 0x26b   : > { %v572_v3 = vpop.f32.mrb[3].mxu1 }
 0x26c   : > { %1403 = vmatprep.mubr.f32.mxu0 %v572_v3 }
 0x26d   : > { %1404 = vmatmul.mubr.f32.gmra.mrb[18].mxu0 %v1349_v2 }
 0x26e   : > { %v1352_v4 = vpop.f32.mrb[4].mxu1 }
 0x26f   : > { %v582_v5 = vpop.f32.mrb[5].mxu1 }
 0x270   : > { %1406 = vmatprep.mubr.f32.mxu0 %v582_v5 }
 0x271   : > { %1407 = vmatmul.mubr.f32.gmra.mrb[20].mxu0 %v1352_v4 }
 0x272   : > { %v1355_v6 = vpop.f32.mrb[6].mxu1 }
 0x273   : > { %v592_v7 = vpop.f32.mrb[7].mxu1 }
 0x274   : > { %1409 = vmatprep.mubr.f32.mxu0 %v592_v7 }
 0x275   : > { %1410 = vmatmul.mubr.f32.gmra.mrb[22].mxu0 %v1355_v6 }
 0x276   : > { %v1358_v8 = vpop.f32.mrb[8].mxu1 }
 0x277   : > { %v602_v9 = vpop.f32.mrb[9].mxu1 }
 0x278   : > { %1412 = vmatprep.mubr.f32.mxu0 %v602_v9 }
 0x279   : > { %1413 = vmatmul.mubr.f32.gmra.mrb[24].mxu0 %v1358_v8 }
 0x27a   : > { %v1361_v10 = vpop.f32.mrb[10].mxu1 }
 0x27b   : > { %v612_v11 = vpop.f32.mrb[11].mxu1 }
 0x27c   : > { %1415 = vmatprep.mubr.f32.mxu0 %v612_v11 }
 0x27d   : > { %1416 = vmatmul.mubr.f32.gmra.mrb[26].mxu0 %v1361_v10 }
 0x27e   : > { %v1364_v12 = vpop.f32.mrb[12].mxu1 }
 0x27f   : > { %v622_v13 = vpop.f32.mrb[13].mxu1 }
 0x280   : > { %1418 = vmatprep.mubr.f32.mxu0 %v622_v13 }
 0x281   : > { %1419 = vmatmul.mubr.f32.gmra.mrb[28].mxu0 %v1364_v12 }
 0x282   : > { %v1367_v14 = vpop.f32.mrb[14].mxu1 }
 0x283   : > { %v632_v15 = vpop.f32.mrb[15].mxu1 }
 0x284   : > { %1421 = vmatprep.mubr.f32.mxu0 %v632_v15 }
 0x285   : > { %1422 = vmatmul.mubr.f32.gmra.mrb[30].mxu0 %v1367_v14 }
 0x33c   : > { %v1402_v16 = vpop.f32.mrb[16].mxu0 }
 0x33d   : > { %v723_v17 = vpop.f32.mrb[17].mxu0 }
 0x33e   : > { %1456 = vmatprep.mubr.f32.mxu1 %v723_v17 }
 0x33f   : > { %1457 = vmatmul.mubr.f32.vlgmr.msra.gmra.mrb[16].mxu1 %v1402_v16 }
 0x340   : > { %v1405_v18 = vpop.f32.mrb[18].mxu0 }
 0x341   : > { %v733_v19 = vpop.f32.mrb[19].mxu0 }
 0x342   : > { %1459 = vmatprep.mubr.f32.mxu1 %v733_v19 }
 0x343   : > { %1460 = vmatmul.mubr.f32.gmra.mrb[18].mxu1 %v1405_v18 }
 0x344   : > { %v1408_v20 = vpop.f32.mrb[20].mxu0 }
 0x345   : > { %v743_v21 = vpop.f32.mrb[21].mxu0 }
 0x346   : > { %1462 = vmatprep.mubr.f32.mxu1 %v743_v21 }
 0x347   : > { %1463 = vmatmul.mubr.f32.gmra.mrb[20].mxu1 %v1408_v20 }
 0x348   : > { %v1411_v22 = vpop.f32.mrb[22].mxu0 }
 0x349   : > { %v753_v23 = vpop.f32.mrb[23].mxu0 }
 0x34a   : > { %1465 = vmatprep.mubr.f32.mxu1 %v753_v23 }
 0x34b   : > { %1466 = vmatmul.mubr.f32.gmra.mrb[22].mxu1 %v1411_v22 }
 0x34c   : > { %v1414_v24 = vpop.f32.mrb[24].mxu0 }
 0x34d   : > { %v763_v25 = vpop.f32.mrb[25].mxu0 }
 0x34e   : > { %1468 = vmatprep.mubr.f32.mxu1 %v763_v25 }
 0x34f   : > { %1469 = vmatmul.mubr.f32.gmra.mrb[24].mxu1 %v1414_v24 }
 0x350   : > { %v1417_v26 = vpop.f32.mrb[26].mxu0 }
 0x351   : > { %v773_v27 = vpop.f32.mrb[27].mxu0 }
 0x352   : > { %1471 = vmatprep.mubr.f32.mxu1 %v773_v27 }
 0x353   : > { %1472 = vmatmul.mubr.f32.gmra.mrb[26].mxu1 %v1417_v26 }
 0x354   : > { %v1420_v28 = vpop.f32.mrb[28].mxu0 }
 0x355   : > { %v783_v29 = vpop.f32.mrb[29].mxu0 }
 0x356   : > { %1474 = vmatprep.mubr.f32.mxu1 %v783_v29 }
 0x357   : > { %1475 = vmatmul.mubr.f32.gmra.mrb[28].mxu1 %v1420_v28 }
 0x358   : > { %v1423_v30 = vpop.f32.mrb[30].mxu0 }
 0x359   : > { %v793_v31 = vpop.f32.mrb[31].mxu0 }
 0x35a   : > { %1477 = vmatprep.mubr.f32.mxu1 %v793_v31 }
 0x35b   : > { %1478 = vmatmul.mubr.f32.gmra.mrb[30].mxu1 %v1423_v30 }
 0x412   : > { %v1458_v32 = vpop.f32.mrb[16].mxu1 }
 0x413   : > { %964 = vst [vmem:[%s2221_s24 + $0x8] sm:$0xff] %v1458_v32  ;;  %v884_v33 = vpop.f32.mrb[17].mxu1 }
 0x414   : > { %963 = vst [vmem:[%s2221_s24] sm:$0xff] %v884_v33 }
 0x416   : > { %v1461_v34 = vpop.f32.mrb[18].mxu1 }
 0x417   : > { %966 = vst [vmem:[%s2221_s24 + $0x18] sm:$0xff] %v1461_v34  ;;  %v894_v35 = vpop.f32.mrb[19].mxu1 }
 0x418   : > { %965 = vst [vmem:[%s2221_s24 + $0x10] sm:$0xff] %v894_v35 }
 0x41a   : > { %v1464_v36 = vpop.f32.mrb[20].mxu1 }
 0x41b   : > { %968 = vst [vmem:[%s2221_s24 + $0x28] sm:$0xff] %v1464_v36  ;;  %v904_v37 = vpop.f32.mrb[21].mxu1 }
 0x41c   : > { %967 = vst [vmem:[%s2221_s24 + $0x20] sm:$0xff] %v904_v37 }
 0x41e   : > { %v1467_v38 = vpop.f32.mrb[22].mxu1 }
 0x41f   : > { %970 = vst [vmem:[%s2221_s24 + $0x38] sm:$0xff] %v1467_v38  ;;  %v914_v39 = vpop.f32.mrb[23].mxu1 }
 0x420   : > { %969 = vst [vmem:[%s2221_s24 + $0x30] sm:$0xff] %v914_v39 }
 0x422   : > { %v1470_v40 = vpop.f32.mrb[24].mxu1 }
 0x423   : > { %972 = vst [vmem:[%s2221_s24 + $0x48] sm:$0xff] %v1470_v40  ;;  %v924_v41 = vpop.f32.mrb[25].mxu1 }
 0x424   : > { %971 = vst [vmem:[%s2221_s24 + $0x40] sm:$0xff] %v924_v41 }
 0x426   : > { %v1473_v42 = vpop.f32.mrb[26].mxu1 }
 0x427   : > { %974 = vst [vmem:[%s2221_s24 + $0x58] sm:$0xff] %v1473_v42  ;;  %v934_v43 = vpop.f32.mrb[27].mxu1 }
 0x428   : > { %973 = vst [vmem:[%s2221_s24 + $0x50] sm:$0xff] %v934_v43 }
 0x42a   : > { %v1476_v44 = vpop.f32.mrb[28].mxu1 }
 0x42b   : > { %976 = vst [vmem:[%s2221_s24 + $0x68] sm:$0xff] %v1476_v44  ;;  %v944_v45 = vpop.f32.mrb[29].mxu1 }
 0x42c   : > { %975 = vst [vmem:[%s2221_s24 + $0x60] sm:$0xff] %v944_v45 }
 0x42e   : > { %v1479_v46 = vpop.f32.mrb[30].mxu1 }
 0x42f   : > { %978 = vst [vmem:[%s2221_s24 + $0x78] sm:$0xff] %v1479_v46  ;;  %v954_v47 = vpop.f32.mrb[31].mxu1 }
 0x430   : > { %977 = vst [vmem:[%s2221_s24 + $0x70] sm:$0xff] %v954_v47 }
 0x431   : > { %1854 = shalt.err (!%p1851_p13)
}
 0x432   : > { %s1855_s28 = scalar_lea.hbm %s2242_s8, 2048  ;;  %s1859_s11 = scalar_lea.hbm %s2295_s5, 4096 }
 0x433   : > { %p1856_p9 = scmp.ne.s32.totalorder %s2242_s8, %s1855_s28  ;;  %p1860_p4 = scmp.lt.u32.totalorder %s2242_s8, %s2295_s5 }
 0x434   : > { %p1861_p8 = scmp.lt.u32.totalorder %s1859_s11, %s1855_s28  ;;  %p1863_p3 = scmp.lt.u32.totalorder %s1855_s28, %s2242_s8 }
 0x435   : > { %p1857_p0 = pnand %p1856_p9, %p2128_p10 }
 0x436   : > { %p1862_p6 = por %p1861_p8, %p1860_p4 }
 0x437   : > { %p1858_p11 = pneg %p1857_p0 }
 0x438   : > { %p1864_p5 = por %p1863_p3, %p1862_p6 }
 0x43a   : > { %p1865_p7 = pnand %p1864_p5, %p1858_p11 }
 0x43c   : > { %1868 = shalt.err (!%p1865_p7)
}
 0x43d   : > { %s1925_s26 = smov 128   ;;  %s1926_s27 = smov 8  }
 0x43e   : > { %1626 = dma.vmem_to_hbm [thread:$0]  (%p2128_p10), %s2244_s23, 2048, %s2242_s8, %s980_s6, %s1925_s26, %s1925_s26, %s1926_s27  }
 0x43f PF: > { %s1008_s13 = sand.u32 1, %s1903_s18   ;;  %p2313_p12 = scmp.ne.s32.totalorder %s2300_s25, 0 }
 0x440   : > { %p2314_p1 = scmp.ge.s32.totalorder %s1915_s21, 2  ;;  %s1009_s22 = scalar_lea.sflag [#allocation4], %s1008_s13 }
 0x442   : > { %p1646_p2 = pnand %p2314_p1, %p2313_p12 }
 0x444   : > { %1898 = dma.done.wait (!%p1646_p2), %s1009_s22, 2048  }
 0x445   : > { %1900 = vsyncadd (!%p1646_p2), %s1009_s22, 4294965248  ;;  %p20_p13 = scmp.ge.s32.totalorder %s2118_s14, 4   ;;  %s2315_s18 = smov %s1907_s19 }
 0x446   : > { %s2316_s19 = smov %s1911_s20  ;;  %s2317_s20 = smov %s2134_s7 }
 0x447   : > { %s2318_s21 = smov %s2118_s14  ;;  %22 = sbr.rel (!%p20_p13) target bundleno = 7 (0x7), region = 101 }
 0x44e   :  { %1014 = vsyncpa [#allocation3], 1 }
 0x44f   :  { %1016 = vsyncpa [#allocation3 + $0x1], 1 }
 0x450   :  { %1017 = vsyncpa [#allocation6], 1 }
 0x451   :  { %1018 = vsyncpa [#allocation9], 1 }
 0x452   :  { %1019 = vsyncpa [#allocation4], 1 }
 0x453   :  { %1021 = vsyncpa [#allocation4 + $0x1], 1 }

// kernel: irm_linear.1
= control target key start
LH: loop header
LB: loop body
LE: loop exit
PB: predicated region body
PF: predicated region fallthrough
CT: control target
= control target key end

     0   :  { %10 = vsyncpa [#allocation3], 0  ;;  %s2290_s0 = inlined_call_operand.hbm [shape: f32[256,128], index: 0, kind: input, shape index: {}]   ;;  %s2291_s1 = inlined_call_operand.hbm [shape: f32[128,128], index: 1, kind: input, shape index: {}]   ;;  %s2292_s2 = inlined_call_operand.hbm [shape: f32[128,128], index: 2, kind: input, shape index: {}]   ;;  %s2293_s3 = inlined_call_operand.hbm [shape: f32[128,128], index: 3, kind: input, shape index: {}]   ;;  %s2294_s4 = inlined_call_operand.hbm [shape: f32[128,128], index: 4, kind: input, shape index: {}]   ;;  %s2295_s5 = inlined_call_operand.hbm [shape: f32[256,128], index: 5, kind: output, shape index: {}]  }
   0x1   :  { %12 = vsyncpa [#allocation3 + $0x1], 0 }
   0x2   :  { %13 = vsyncpa [#allocation6], 0 }
   0x3   :  { %14 = vsyncpa [#allocation9], 0 }
   0x4   :  { %15 = vsyncpa [#allocation4], 0 }
   0x5   :  { %17 = vsyncpa [#allocation4 + $0x1], 0  ;;  %s1957_s18 = smov 0   ;;  %s1959_s19 = smov 0  }
   0x6   :  { %s1961_s20 = smov 0   ;;  %s1963_s21 = smov 0  }
   0x7 LB: > { %s1978_s22 = sadd.s32 4294967295, %s1915_s21   ;;  %s1104_s23 = sadd.s32 4294967294, %s1915_s21   ;;  %s1915_s21 = sphi %s1963_s21, %s2318_s21   ;;  %s1911_s20 = sphi %s1961_s20, %s2317_s20   ;;  %s1907_s19 = sphi %s1959_s19, %s2316_s19   ;;  %s1903_s18 = sphi %s1957_s18, %s2315_s18  }
   0x8   : > { %p43_p0 = scmp.ne.s32.totalorder %s1907_s19, %s1903_s18  ;;  %p2296_p1 = scmp.eq.s32.totalorder %s1978_s22, 0 }
   0x9   : > { %p157_p3 = scmp.eq.s32.totalorder %s1104_s23, 1  ;;  %p1105_p5 = scmp.ge.s32.totalorder %s1915_s21, 1 }
   0xa   : > { %p1987_p4 = por %p2296_p1, %p43_p0  ;;  %p164_p7 = scmp.lt.s32.totalorder %s1915_s21, 3 }
   0xb   : > { %p1992_p6 = por %p157_p3, %p43_p0  ;;  %s1917_s27 = smov [#allocation5]  }
   0xc   : > { %s2299_s24 = scalar_select %p1987_p4, 1, 0 }
   0xd   : > { %s2300_s25 = scalar_select %p1992_p6, 1, 0 }
   0xe   : > { %p1997_p8 = pnand %p1105_p5, %p164_p7  ;;  %s176_s28 = sshll.u32 %s1917_s27, 4  ;;  %s2001_s28 = int_to_ptr.vmem [resolvable:$true] %s176_s28 }
   0xf   : > { %s1918_s30 = smov [#allocation8]   ;;  %s1919_s7 = smov [#allocation7]  }
  0x10   : > { %s2301_s26 = scalar_select %p1997_p8, 1, 0 }
  0x11   : > { %p1628_p9 = pneg %p1997_p8  ;;  %s202_s6 = sshll.u32 %s1918_s30, 4  ;;  %s2012_s6 = int_to_ptr.vmem [resolvable:$true] %s202_s6 }
  0x12   : > { %s2014_s8 = sshll.u32 %s1919_s7, 4  ;;  %s1699_s11 = scalar_lea.hbm %s2291_s1, 2048  ;;  %s190_s8 = int_to_ptr.vmem [resolvable:$true] %s2014_s8 }
  0x13   : > { %p2008_p11 = pnand %p1628_p9, %p2296_p1  ;;  %p1700_p12 = scmp.ne.s32.totalorder %s2291_s1, %s1699_s11 }
  0x14   : > { %p1706_p5 = scmp.lt.u32.totalorder %s1699_s11, %s2291_s1 }
  0x15   : > { %p2024_p13 = pneg %p2008_p11 }
  0x17   : > { %p1702_p0 = pnand %p2024_p13, %p1700_p12 }
  0x19   : > { %p1703_p3 = pneg %p1702_p0 }
  0x1b   : > { %p1708_p7 = pnand %p1706_p5, %p1703_p3 }
  0x1d   : > { %1711 = shalt.err (!%p1708_p7)
}
  0x1e   : > { %s1712_s17 = scalar_lea.vmem %s2001_s28, 2048  ;;  %p1720_p2 = scmp.lt.s32.totalorder %s2001_s28, %s2001_s28 }
  0x1f   : > { %p1713_p9 = scmp.ne.s32.totalorder %s2001_s28, %s1712_s17  ;;  %p1721_p6 = scmp.lt.s32.totalorder %s1712_s17, %s1712_s17 }
  0x21   : > { %p1715_p10 = pnand %p1713_p9, %p2024_p13  ;;  %p1722_p12 = por %p1721_p6, %p1720_p2 }
  0x23   : > { %p1716_p1 = pneg %p1715_p10 }
  0x25   : > { %p1723_p0 = pnand %p1722_p12, %p1716_p1 }
  0x27   : > { %1726 = shalt.err (!%p1723_p0)
}
  0x28   : > { %s1920_s23 = smov 128   ;;  %s1921_s27 = smov 8  }
  0x29   : > { %1631 = dma.hbm_to_vmem [thread:$0]  (!%p2008_p11), %s2291_s1, 2048, %s2001_s28, [#allocation6], %s1920_s23, %s1920_s23, %s1921_s27  }
  0x2a   : > { %s1727_s11 = scalar_lea.hbm %s2293_s3, 2048 }
  0x2b   : > { %p1728_p1 = scmp.ne.s32.totalorder %s2293_s3, %s1727_s11  ;;  %p1734_p10 = scmp.lt.u32.totalorder %s1727_s11, %s2293_s3 }
  0x2d   : > { %p1730_p2 = pnand %p1728_p1, %p2024_p13 }
  0x2f   : > { %p1731_p6 = pneg %p1730_p2 }
  0x31   : > { %p1736_p3 = pnand %p1734_p10, %p1731_p6 }
  0x33   : > { %1739 = shalt.err (!%p1736_p3)
}
  0x34   : > { %s1740_s28 = scalar_lea.vmem %s2012_s6, 2048  ;;  %p1748_p12 = scmp.lt.s32.totalorder %s2012_s6, %s2012_s6 }
  0x35   : > { %p1741_p5 = scmp.ne.s32.totalorder %s2012_s6, %s1740_s28  ;;  %p1749_p0 = scmp.lt.s32.totalorder %s1740_s28, %s1740_s28 }
  0x37   : > { %p1743_p7 = pnand %p1741_p5, %p2024_p13  ;;  %p1750_p1 = por %p1749_p0, %p1748_p12 }
  0x39   : > { %p1744_p9 = pneg %p1743_p7 }
  0x3b   : > { %p1751_p2 = pnand %p1750_p1, %p1744_p9 }
  0x3d   : > { %1754 = shalt.err (!%p1751_p2)
}
  0x3e   : > { %1637 = dma.hbm_to_vmem [thread:$0]  (!%p2008_p11), %s2293_s3, 2048, %s2012_s6, [#allocation9], %s1920_s23, %s1920_s23, %s1921_s27  }
  0x3f   : > { %s1755_s10 = scalar_lea.hbm %s2292_s2, 2048 }
  0x40   : > { %p1756_p6 = scmp.ne.s32.totalorder %s2292_s2, %s1755_s10  ;;  %p1762_p5 = scmp.lt.u32.totalorder %s1755_s10, %s2292_s2 }
  0x42   : > { %p1758_p10 = pnand %p1756_p6, %p2024_p13 }
  0x44   : > { %p1759_p3 = pneg %p1758_p10 }
  0x46   : > { %p1764_p7 = pnand %p1762_p5, %p1759_p3 }
  0x48   : > { %1767 = shalt.err (!%p1764_p7)
}
  0x49   : > { %s1768_s16 = scalar_lea.vmem %s190_s8, 2048  ;;  %p1776_p1 = scmp.lt.s32.totalorder %s190_s8, %s190_s8 }
  0x4a   : > { %p1769_p9 = scmp.ne.s32.totalorder %s190_s8, %s1768_s16  ;;  %p1777_p2 = scmp.lt.s32.totalorder %s1768_s16, %s1768_s16 }
  0x4c   : > { %p1771_p12 = pnand %p1769_p9, %p2024_p13  ;;  %p1778_p4 = por %p1777_p2, %p1776_p1 }
  0x4e   : > { %p1772_p0 = pneg %p1771_p12 }
  0x50   : > { %p1779_p8 = pnand %p1778_p4, %p1772_p0 }
  0x52   : > { %1782 = shalt.err (!%p1779_p8)
}
  0x53   : > { %1634 = dma.hbm_to_vmem [thread:$0]  (!%p2008_p11), %s2292_s2, 2048, %s190_s8, [#allocation6], %s1920_s23, %s1920_s23, %s1921_s27  }
  0x54   : > { %s1922_s17 = smov [#allocation10]   ;;  %s1783_s10 = scalar_lea.hbm %s2294_s4, 2048 }
  0x55   : > { %s215_s30 = sshll.u32 %s1922_s17, 4  ;;  %p1784_p4 = scmp.ne.s32.totalorder %s2294_s4, %s1783_s10  ;;  %s216_s30 = int_to_ptr.vmem [resolvable:$true] %s215_s30 }
  0x56   : > { %p1790_p10 = scmp.lt.u32.totalorder %s1783_s10, %s2294_s4 }
  0x57   : > { %p1786_p8 = pnand %p1784_p4, %p2024_p13 }
  0x59   : > { %p1787_p6 = pneg %p1786_p8 }
  0x5b   : > { %p1792_p3 = pnand %p1790_p10, %p1787_p6 }
  0x5d   : > { %1795 = shalt.err (!%p1792_p3)
}
  0x5e   : > { %s1796_s8 = scalar_lea.vmem %s216_s30, 2048  ;;  %p1804_p12 = scmp.lt.s32.totalorder %s216_s30, %s216_s30 }
  0x5f   : > { %p1797_p5 = scmp.ne.s32.totalorder %s216_s30, %s1796_s8  ;;  %p1805_p0 = scmp.lt.s32.totalorder %s1796_s8, %s1796_s8 }
  0x61   : > { %p1799_p7 = pnand %p1797_p5, %p2024_p13  ;;  %p1806_p1 = por %p1805_p0, %p1804_p12 }
  0x63   : > { %p1800_p9 = pneg %p1799_p7 }
  0x65   : > { %p1807_p2 = pnand %p1806_p1, %p1800_p9 }
  0x67   : > { %1810 = shalt.err (!%p1807_p2)
}
  0x68   : > { %1640 = dma.hbm_to_vmem [thread:$0]  (!%p2008_p11), %s2294_s4, 2048, %s216_s30, [#allocation9], %s1920_s23, %s1920_s23, %s1921_s27  }
  0x69   : > { %s2118_s14 = sadd.s32 1, %s1915_s21   ;;  %s30_s29 = sadd.s32 1, %s1911_s20 }
  0x6a   : > { %s27_s28 = ssub.s32 %s1915_s21, %s2118_s14  ;;  %p37_p13 = scmp.ne.s32.totalorder %s1911_s20, %s1907_s19 }
  0x6b   : > { %p28_p4 = scmp.eq.s32.totalorder %s27_s28, 0  ;;  %p38_p8 = scmp.eq.s32.totalorder %s1915_s21, 0 }
  0x6c   : > { %p2304_p6 = scmp.eq.s32.totalorder %s1978_s22, 1  ;;  %p1653_p3 = scmp.lt.s32.totalorder %s1915_s21, 2 }
  0x6d   : > { %s2134_s7 = scalar_select %p28_p4, %s1911_s20, %s30_s29  }
  0x6e   : > { %p2128_p10 = por %p2304_p6, %p37_p13  ;;  %p39_p5 = por %p38_p8, %p37_p13 }
  0x6f   : > { %s229_s9 = sand.u32 1, %s1911_s20   ;;  %s1126_s30 = sshll.u32 %s1915_s21, 11 }
  0x70   : > { %s1111_s10 = sshll.u32 %s229_s9, 7  ;;  %s2141_s13 = scalar_lea.hbm %s2290_s0, %s1126_s30 }
  0x71   : > { %s233_s15 = scalar_lea.vmem [#allocation2], %s1111_s10  ;;  %p2145_p11 = pnand %p1653_p3, %p39_p5 }
  0x72   : > { %s240_s8 = sshll.u32 %s233_s15, 4  ;;  %s2149_s6 = scalar_lea.sflag [#allocation3], %s229_s9  ;;  %s2143_s8 = int_to_ptr.vmem [resolvable:$true] %s240_s8 }
  0x73   : > { %s1811_s29 = scalar_lea.hbm %s2141_s13, 2048  ;;  %p1813_p9 = pneg %p2145_p11 }
  0x74   : > { %p1812_p7 = scmp.ne.s32.totalorder %s2141_s13, %s1811_s29  ;;  %s1816_s30 = scalar_lea.hbm %s2290_s0, 4096 }
  0x75   : > { %p1817_p1 = scmp.lt.u32.totalorder %s2141_s13, %s2290_s0  ;;  %p1818_p2 = scmp.lt.u32.totalorder %s1816_s30, %s1811_s29 }
  0x76   : > { %p1814_p12 = pnand %p1813_p9, %p1812_p7  ;;  %p1820_p4 = scmp.lt.u32.totalorder %s1811_s29, %s2141_s13 }
  0x77   : > { %p1819_p13 = por %p1818_p2, %p1817_p1 }
  0x78   : > { %p1815_p0 = pneg %p1814_p12 }
  0x79   : > { %p1821_p8 = por %p1820_p4, %p1819_p13 }
  0x7b   : > { %p1822_p6 = pnand %p1821_p8, %p1815_p0 }
  0x7d   : > { %1825 = shalt.err (!%p1822_p6)
}
  0x7e   : > { %s1826_s9 = scalar_lea.vmem %s2143_s8, 2048  ;;  %s1923_s15 = smov [#allocation2]  }
  0x7f   : > { %p1827_p3 = scmp.ne.s32.totalorder %s2143_s8, %s1826_s9  ;;  %s1831_s28 = sshll.u32 %s1923_s15, 4  ;;  %s1832_s28 = int_to_ptr.vmem [resolvable:$false] %s1831_s28 }
  0x80   : > { %s1833_s10 = scalar_lea.vmem %s1832_s28, 4096  ;;  %p1834_p12 = scmp.lt.s32.totalorder %s2143_s8, %s1832_s28 }
  0x81   : > { %p1829_p5 = pnand %p1827_p3, %p1813_p9  ;;  %p1835_p1 = scmp.lt.s32.totalorder %s1833_s10, %s1826_s9 }
  0x83   : > { %p1830_p7 = pneg %p1829_p5  ;;  %p1836_p2 = por %p1835_p1, %p1834_p12 }
  0x85   : > { %p1837_p13 = pnand %p1836_p2, %p1830_p7 }
  0x87   : > { %1840 = shalt.err (!%p1837_p13)
}
  0x88   : > { %1644 = dma.hbm_to_vmem [thread:$0]  (!%p2145_p11), %s2141_s13, 2048, %s2143_s8, %s2149_s6, %s1920_s23, %s1920_s23, %s1921_s27  }
  0x89   : > { %p2307_p9 = scmp.ne.s32.totalorder %s2301_s26, 0 }
  0x8a   : > { %s2183_s29 = sand.u32 (!%p2307_p9), 1, %s1907_s19   ;;  %p2308_p0 = scmp.ne.s32.totalorder (!%p2307_p9), %s2299_s24, 0 }
  0x8b   : > { %252 = sbr.rel (%p2307_p9) target bundleno = 1087 (0x43f), region = 40  ;;  %s1115_s30 = sshll.u32 (!%p2307_p9), %s2183_s29, 7 }
  0x8c   : > { %s255_s11 = scalar_lea.sflag (!%p2307_p9), [#allocation3], %s2183_s29  ;;  %s2189_s16 = scalar_lea.vmem (!%p2307_p9), [#allocation2], %s1115_s30 }
  0x92   : > { %1886 = dma.done.wait (%p2308_p0), %s255_s11, 2048  }
  0x93   : > { %1888 = vsyncadd (%p2308_p0), %s255_s11, 4294965248  ;;  %p2309_p11 = scmp.eq.s32.totalorder %s1978_s22, 0 }
  0x95   : > { %1890 = dma.done.wait (%p2309_p11), [#allocation6], 4096   ;;  %p2310_p4 = pmov %p2309_p11 }
  0x97   : > { %1892 = vsyncadd (%p2310_p4), [#allocation6], 4294963200  ;;  %p2311_p8 = pmov %p2310_p4 }
  0x98   : > { %p2312_p6 = pmov %p2310_p4 }
  0x99   : > { %1894 = dma.done.wait (%p2311_p8), [#allocation9], 4096  }
  0x9a   : > { %1896 = vsyncadd (%p2312_p6), [#allocation9], 4294963200  ;;  %v319_v0 = vld [vmem:[#allocation5] sm:$0xff]  ;;  %v320_v1 = vld [vmem:[#allocation5 + $0x8] sm:$0xff]  ;;  %s2221_s24 = scalar_lea.vmem [#allocation11], %s1115_s30  ;;  %s1127_s26 = sshll.u32 %s1978_s22, 11 }
  0x9b   : > { %v321_v2 = vld [vmem:[#allocation5 + $0x10] sm:$0xff]  ;;  %v1480_v3 = vpack.c.bf16 %v320_v1, %v319_v0  ;;  %v322_v4 = vld [vmem:[#allocation5 + $0x18] sm:$0xff]  ;;  %v323_v6 = vld [vmem:[#allocation5 + $0x20] sm:$0xff]  ;;  %s993_s23 = sshll.u32 %s2221_s24, 4  ;;  %s2242_s8 = scalar_lea.hbm %s2295_s5, %s1127_s26  ;;  %s2244_s23 = int_to_ptr.vmem [resolvable:$true] %s993_s23 }
  0x9c   : > { %v1484_v5 = vpack.c.bf16 %v322_v4, %v321_v2  ;;  %v324_v7 = vld [vmem:[#allocation5 + $0x28] sm:$0xff]  ;;  %v303_v9 = vld [vmem:[%s2189_s16] sm:$0xff]  ;;  %v325_v10 = vld [vmem:[#allocation5 + $0x30] sm:$0xff]  ;;  %s980_s6 = scalar_lea.sflag [#allocation4], %s2183_s29  ;;  %s1841_s22 = scalar_lea.vmem %s2244_s23, 2048 }
  0x9d   : > { %1481 = vmatprep.subr.bf16.mxu0 %v1480_v3  ;;  %v1488_v8 = vpack.c.bf16 %v324_v7, %v323_v6  ;;  %v326_v11 = vld [vmem:[#allocation5 + $0x38] sm:$0xff]  ;;  %1288 = vmatprep.mubr.f32.mxu0 %v303_v9  ;;  %v327_v13 = vld [vmem:[#allocation5 + $0x40] sm:$0xff]  ;;  %v328_v14 = vld [vmem:[#allocation5 + $0x48] sm:$0xff]  ;;  %p1842_p3 = scmp.ne.s32.totalorder %s2244_s23, %s1841_s22  ;;  %s1924_s12 = smov [#allocation11]  }
  0x9e   : > { %1483 = vmatpush3.bf16.msra.mxu0 %v1480_v3  ;;  %v1492_v12 = vpack.c.bf16 %v326_v11, %v325_v10  ;;  %v480_v15 = vld [vmem:[#allocation7] sm:$0xff]  ;;  %v481_v16 = vld [vmem:[#allocation7 + $0x8] sm:$0xff]  ;;  %v482_v17 = vld [vmem:[#allocation7 + $0x10] sm:$0xff]  ;;  %v1496_v21 = vpack.c.bf16 %v328_v14, %v327_v13  ;;  %s1845_s9 = sshll.u32 %s1924_s12, 4  ;;  %s1846_s9 = int_to_ptr.vmem [resolvable:$false] %s1845_s9 }
  0x9f   : > { %1485 = vmatprep.subr.bf16.mxu0 %v1484_v5  ;;  %v483_v18 = vld [vmem:[#allocation7 + $0x18] sm:$0xff]  ;;  %v1512_v19 = vpack.c.bf16 %v481_v16, %v480_v15  ;;  %v484_v22 = vld [vmem:[#allocation7 + $0x20] sm:$0xff]  ;;  %v485_v23 = vld [vmem:[#allocation7 + $0x28] sm:$0xff]  ;;  %p1843_p5 = pnand %p1842_p3, %p2128_p10  ;;  %s1847_s15 = scalar_lea.vmem %s1846_s9, 4096 }
  0xa0   : > { %v1516_v20 = vpack.c.bf16 %v483_v18, %v482_v17  ;;  %v329_v24 = vld [vmem:[#allocation5 + $0x50] sm:$0xff]  ;;  %v330_v25 = vld [vmem:[#allocation5 + $0x58] sm:$0xff]  ;;  %v1520_v26 = vpack.c.bf16 %v485_v23, %v484_v22  ;;  %v331_v30 = vld [vmem:[#allocation5 + $0x60] sm:$0xff]  ;;  %p1848_p12 = scmp.lt.s32.totalorder %s2244_s23, %s1846_s9  ;;  %p1849_p1 = scmp.lt.s32.totalorder %s1847_s15, %s1841_s22 }
  0xa1   : > { %1513 = vmatprep.subr.bf16.mxu1 %v1512_v19  ;;  %v1500_v27 = vpack.c.bf16 %v330_v25, %v329_v24  ;;  %v486_v28 = vld [vmem:[#allocation7 + $0x30] sm:$0xff]  ;;  %v487_v29 = vld [vmem:[#allocation7 + $0x38] sm:$0xff]  ;;  %v332_v31 = vld [vmem:[#allocation5 + $0x68] sm:$0xff]  ;;  %p1844_p7 = pneg %p1843_p5 }
  0xa2   : > { %1487 = vmatpush3.bf16.msra.mxu0 %v1484_v5  ;;  %1515 = vmatpush3.bf16.msra.mxu1 %v1512_v19  ;;  %v1524_v32 = vpack.c.bf16 %v487_v29, %v486_v28  ;;  %v1504_v33 = vpack.c.bf16 %v332_v31, %v331_v30  ;;  %v488_v34 = vld [vmem:[#allocation7 + $0x40] sm:$0xff]  ;;  %v489_v35 = vld [vmem:[#allocation7 + $0x48] sm:$0xff]  ;;  %v333_v36 = vld [vmem:[#allocation5 + $0x70] sm:$0xff]  ;;  %p1850_p2 = por %p1849_p1, %p1848_p12 }
  0xa3   : > { %1489 = vmatprep.subr.bf16.mxu0 %v1488_v8  ;;  %1517 = vmatprep.subr.bf16.mxu1 %v1516_v20  ;;  %v334_v37 = vld [vmem:[#allocation5 + $0x78] sm:$0xff]  ;;  %v1528_v38 = vpack.c.bf16 %v489_v35, %v488_v34  ;;  %v490_v40 = vld [vmem:[#allocation7 + $0x50] sm:$0xff]  ;;  %v492_v43 = vld [vmem:[#allocation7 + $0x60] sm:$0xff] }
  0xa4   : > { %v1508_v39 = vpack.c.bf16 %v334_v37, %v333_v36  ;;  %v491_v41 = vld [vmem:[#allocation7 + $0x58] sm:$0xff]  ;;  %v493_v44 = vld [vmem:[#allocation7 + $0x68] sm:$0xff]  ;;  %v305_v47 = vld [vmem:[%s2189_s16 + $0x10] sm:$0xff]  ;;  %p1851_p13 = pnand %p1850_p2, %p1844_p7 }
  0xa5   : > { %v1532_v42 = vpack.c.bf16 %v491_v41, %v490_v40  ;;  %v304_v45 = vld [vmem:[%s2189_s16 + $0x8] sm:$0xff]  ;;  %v1536_v46 = vpack.c.bf16 %v493_v44, %v492_v43  ;;  %v494_v48 = vld [vmem:[#allocation7 + $0x70] sm:$0xff]  ;;  %v495_v49 = vld [vmem:[#allocation7 + $0x78] sm:$0xff] }
  0xa6   : > { %1491 = vmatpush3.bf16.msra.mxu0 %v1488_v8  ;;  %1519 = vmatpush3.bf16.msra.mxu1 %v1516_v20  ;;  %v306_v50 = vld [vmem:[%s2189_s16 + $0x18] sm:$0xff]  ;;  %v1540_v51 = vpack.c.bf16 %v495_v49, %v494_v48  ;;  %v307_v52 = vld [vmem:[%s2189_s16 + $0x20] sm:$0xff]  ;;  %v308_v53 = vld [vmem:[%s2189_s16 + $0x28] sm:$0xff] }
  0xa7   : > { %1493 = vmatprep.subr.bf16.mxu0 %v1492_v12  ;;  %1521 = vmatprep.subr.bf16.mxu1 %v1520_v26  ;;  %v309_v54 = vld [vmem:[%s2189_s16 + $0x30] sm:$0xff]  ;;  %v310_v55 = vld [vmem:[%s2189_s16 + $0x38] sm:$0xff]  ;;  %v311_v56 = vld [vmem:[%s2189_s16 + $0x40] sm:$0xff] }
  0xa8   : > { %v312_v57 = vld [vmem:[%s2189_s16 + $0x48] sm:$0xff]  ;;  %v313_v58 = vld [vmem:[%s2189_s16 + $0x50] sm:$0xff]  ;;  %v314_v59 = vld [vmem:[%s2189_s16 + $0x58] sm:$0xff] }
  0xa9   : > { %v315_v60 = vld [vmem:[%s2189_s16 + $0x60] sm:$0xff]  ;;  %v316_v61 = vld [vmem:[%s2189_s16 + $0x68] sm:$0xff]  ;;  %v317_v62 = vld [vmem:[%s2189_s16 + $0x70] sm:$0xff] }
  0xaa   : > { %1495 = vmatpush3.bf16.msra.mxu0 %v1492_v12  ;;  %1523 = vmatpush3.bf16.msra.mxu1 %v1520_v26  ;;  %v318_v63 = vld [vmem:[%s2189_s16 + $0x78] sm:$0xff]  ;;  %v641_v0 = vld [vmem:[#allocation8] sm:$0xff]  ;;  %v642_v1 = vld [vmem:[#allocation8 + $0x8] sm:$0xff] }
  0xab   : > { %1497 = vmatprep.subr.bf16.mxu0 %v1496_v21  ;;  %1525 = vmatprep.subr.bf16.mxu1 %v1524_v32  ;;  %v643_v2 = vld [vmem:[#allocation8 + $0x10] sm:$0xff]  ;;  %v1544_v3 = vpack.c.bf16 %v642_v1, %v641_v0  ;;  %v644_v4 = vld [vmem:[#allocation8 + $0x18] sm:$0xff]  ;;  %v645_v6 = vld [vmem:[#allocation8 + $0x20] sm:$0xff] }
  0xac   : > { %v1548_v5 = vpack.c.bf16 %v644_v4, %v643_v2  ;;  %v646_v7 = vld [vmem:[#allocation8 + $0x28] sm:$0xff]  ;;  %v647_v9 = vld [vmem:[#allocation8 + $0x30] sm:$0xff]  ;;  %v648_v10 = vld [vmem:[#allocation8 + $0x38] sm:$0xff] }
  0xad   : > { %v1552_v8 = vpack.c.bf16 %v646_v7, %v645_v6  ;;  %v1556_v11 = vpack.c.bf16 %v648_v10, %v647_v9  ;;  %v649_v12 = vld [vmem:[#allocation8 + $0x40] sm:$0xff]  ;;  %v650_v13 = vld [vmem:[#allocation8 + $0x48] sm:$0xff]  ;;  %v651_v15 = vld [vmem:[#allocation8 + $0x50] sm:$0xff] }
  0xae   : > { %1499 = vmatpush3.bf16.msra.mxu0 %v1496_v21  ;;  %1527 = vmatpush3.bf16.msra.mxu1 %v1524_v32  ;;  %v1560_v14 = vpack.c.bf16 %v650_v13, %v649_v12  ;;  %v652_v16 = vld [vmem:[#allocation8 + $0x58] sm:$0xff]  ;;  %v653_v18 = vld [vmem:[#allocation8 + $0x60] sm:$0xff]  ;;  %v654_v19 = vld [vmem:[#allocation8 + $0x68] sm:$0xff] }
  0xaf   : > { %1501 = vmatprep.subr.bf16.mxu0 %v1500_v27  ;;  %1529 = vmatprep.subr.bf16.mxu1 %v1528_v38  ;;  %v1564_v17 = vpack.c.bf16 %v652_v16, %v651_v15  ;;  %v1568_v20 = vpack.c.bf16 %v654_v19, %v653_v18  ;;  %v655_v21 = vld [vmem:[#allocation8 + $0x70] sm:$0xff]  ;;  %v656_v22 = vld [vmem:[#allocation8 + $0x78] sm:$0xff]  ;;  %v802_v40 = vld [vmem:[#allocation10] sm:$0xff] }
  0xb0   : > { %v1572_v23 = vpack.c.bf16 %v656_v22, %v655_v21  ;;  %v803_v41 = vld [vmem:[#allocation10 + $0x8] sm:$0xff]  ;;  %v805_v44 = vld [vmem:[#allocation10 + $0x18] sm:$0xff]  ;;  %v808_v49 = vld [vmem:[#allocation10 + $0x30] sm:$0xff] }
  0xb1   : > { %v1576_v43 = vpack.c.bf16 %v803_v41, %v802_v40 }
  0xb2   : > { %1503 = vmatpush3.bf16.msra.mxu0 %v1500_v27  ;;  %1531 = vmatpush3.bf16.msra.mxu1 %v1528_v38 }
  0xb3   : > { %1505 = vmatprep.subr.bf16.mxu0 %v1504_v33  ;;  %1533 = vmatprep.subr.bf16.mxu1 %v1532_v42 }
  0xb6   : > { %1507 = vmatpush3.bf16.msra.mxu0 %v1504_v33  ;;  %1535 = vmatpush3.bf16.msra.mxu1 %v1532_v42  ;;  %v804_v42 = vld [vmem:[#allocation10 + $0x10] sm:$0xff] }
  0xb7   : > { %1509 = vmatprep.subr.bf16.mxu0 %v1508_v39  ;;  %1537 = vmatprep.subr.bf16.mxu1 %v1536_v46 }
  0xba   : > { %1511 = vmatpush3.bf16.msra.mxu0 %v1508_v39  ;;  %1539 = vmatpush3.bf16.msra.mxu1 %v1536_v46  ;;  %v806_v46 = vld [vmem:[#allocation10 + $0x20] sm:$0xff] }
  0xbb   : > { %1541 = vmatprep.subr.bf16.mxu1 %v1540_v51  ;;  %1545 = vmatprep.subr.bf16.mxu0 %v1544_v3 }
  0xbd   : > { %1289 = vmatmul.mubr.f32.vlgmr.msra.gmra.mrb[0].mxu0 %v304_v45  ;;  %v1580_v45 = vpack.c.bf16 %v805_v44, %v804_v42 }
  0xbe   : > { %1291 = vmatprep.mubr.f32.mxu0 %v305_v47  ;;  %1543 = vmatpush3.bf16.msra.mxu1 %v1540_v51  ;;  %v807_v47 = vld [vmem:[#allocation10 + $0x28] sm:$0xff] }
  0xbf   : > { %1547 = vmatpush3.bf16.msra.mxu0 %v1544_v3  ;;  %1577 = vmatprep.subr.bf16.mxu1 %v1576_v43  ;;  %v1584_v48 = vpack.c.bf16 %v807_v47, %v806_v46 }
  0xc0   : > { %1549 = vmatprep.subr.bf16.mxu0 %v1548_v5 }
  0xc1   : > { %1292 = vmatmul.mubr.f32.gmra.mrb[2].mxu0 %v306_v50  ;;  %v809_v50 = vld [vmem:[#allocation10 + $0x38] sm:$0xff] }
  0xc2   : > { %1294 = vmatprep.mubr.f32.mxu0 %v307_v52  ;;  %v1588_v51 = vpack.c.bf16 %v809_v50, %v808_v49  ;;  %v810_v52 = vld [vmem:[#allocation10 + $0x40] sm:$0xff] }
  0xc3   : > { %1551 = vmatpush3.bf16.msra.mxu0 %v1548_v5 }
  0xc4   : > { %1553 = vmatprep.subr.bf16.mxu0 %v1552_v8 }
  0xc5   : > { %1295 = vmatmul.mubr.f32.gmra.mrb[4].mxu0 %v308_v53  ;;  %v811_v53 = vld [vmem:[#allocation10 + $0x48] sm:$0xff] }
  0xc6   : > { %1297 = vmatprep.mubr.f32.mxu0 %v309_v54  ;;  %v1592_v54 = vpack.c.bf16 %v811_v53, %v810_v52 }
  0xc7   : > { %1555 = vmatpush3.bf16.msra.mxu0 %v1552_v8 }
  0xc8   : > { %1557 = vmatprep.subr.bf16.mxu0 %v1556_v11 }
  0xc9   : > { %1298 = vmatmul.mubr.f32.gmra.mrb[6].mxu0 %v310_v55  ;;  %v812_v55 = vld [vmem:[#allocation10 + $0x50] sm:$0xff] }
  0xca   : > { %1300 = vmatprep.mubr.f32.mxu0 %v311_v56  ;;  %v813_v56 = vld [vmem:[#allocation10 + $0x58] sm:$0xff] }
  0xcb   : > { %1559 = vmatpush3.bf16.msra.mxu0 %v1556_v11 }
  0xcc   : > { %1561 = vmatprep.subr.bf16.mxu0 %v1560_v14 }
  0xcd   : > { %1301 = vmatmul.mubr.f32.gmra.mrb[8].mxu0 %v312_v57  ;;  %v1596_v57 = vpack.c.bf16 %v813_v56, %v812_v55 }
  0xce   : > { %1303 = vmatprep.mubr.f32.mxu0 %v313_v58  ;;  %v814_v58 = vld [vmem:[#allocation10 + $0x60] sm:$0xff] }
  0xcf   : > { %1563 = vmatpush3.bf16.msra.mxu0 %v1560_v14 }
  0xd0   : > { %1565 = vmatprep.subr.bf16.mxu0 %v1564_v17 }
  0xd1   : > { %1304 = vmatmul.mubr.f32.gmra.mrb[10].mxu0 %v314_v59  ;;  %v815_v59 = vld [vmem:[#allocation10 + $0x68] sm:$0xff] }
  0xd2   : > { %1306 = vmatprep.mubr.f32.mxu0 %v315_v60  ;;  %v1600_v60 = vpack.c.bf16 %v815_v59, %v814_v58 }
  0xd3   : > { %1567 = vmatpush3.bf16.msra.mxu0 %v1564_v17 }
  0xd4   : > { %1569 = vmatprep.subr.bf16.mxu0 %v1568_v20 }
  0xd5   : > { %1307 = vmatmul.mubr.f32.gmra.mrb[12].mxu0 %v316_v61  ;;  %v816_v61 = vld [vmem:[#allocation10 + $0x70] sm:$0xff] }
  0xd6   : > { %1309 = vmatprep.mubr.f32.mxu0 %v317_v62  ;;  %v817_v62 = vld [vmem:[#allocation10 + $0x78] sm:$0xff] }
  0xd7   : > { %1571 = vmatpush3.bf16.msra.mxu0 %v1568_v20 }
  0xd8   : > { %1573 = vmatprep.subr.bf16.mxu0 %v1572_v23 }
  0xd9   : > { %1310 = vmatmul.mubr.f32.gmra.mrb[14].mxu0 %v318_v63  ;;  %v1604_v63 = vpack.c.bf16 %v817_v62, %v816_v61 }
  0xdb   : > { %1575 = vmatpush3.bf16.msra.mxu0 %v1572_v23 }
 0x190   : > { %v1290_v24 = vpop.f32.mrb[0].mxu0 }
 0x191   : > { %v401_v25 = vpop.f32.mrb[1].mxu0 }
 0x192   : > { %1344 = vmatprep.mubr.f32.mxu1 %v401_v25 }
 0x193   : > { %1345 = vmatmul.mubr.f32.vlgmr.msra.gmra.mrb[0].mxu1 %v1290_v24 }
 0x194   : > { %v1293_v26 = vpop.f32.mrb[2].mxu0  ;;  %1579 = vmatpush3.bf16.msra.mxu1 %v1576_v43 }
 0x195   : > { %v411_v27 = vpop.f32.mrb[3].mxu0  ;;  %1581 = vmatprep.subr.bf16.mxu1 %v1580_v45 }
 0x196   : > { %1347 = vmatprep.mubr.f32.mxu1 %v411_v27 }
 0x197   : > { %1348 = vmatmul.mubr.f32.gmra.mrb[2].mxu1 %v1293_v26 }
 0x198   : > { %v1296_v28 = vpop.f32.mrb[4].mxu0  ;;  %1583 = vmatpush3.bf16.msra.mxu1 %v1580_v45 }
 0x199   : > { %v421_v29 = vpop.f32.mrb[5].mxu0  ;;  %1585 = vmatprep.subr.bf16.mxu1 %v1584_v48 }
 0x19a   : > { %1350 = vmatprep.mubr.f32.mxu1 %v421_v29 }
 0x19b   : > { %1351 = vmatmul.mubr.f32.gmra.mrb[4].mxu1 %v1296_v28 }
 0x19c   : > { %v1299_v30 = vpop.f32.mrb[6].mxu0  ;;  %1587 = vmatpush3.bf16.msra.mxu1 %v1584_v48 }
 0x19d   : > { %v431_v31 = vpop.f32.mrb[7].mxu0  ;;  %1589 = vmatprep.subr.bf16.mxu1 %v1588_v51 }
 0x19e   : > { %1353 = vmatprep.mubr.f32.mxu1 %v431_v31 }
 0x19f   : > { %1354 = vmatmul.mubr.f32.gmra.mrb[6].mxu1 %v1299_v30 }
 0x1a0   : > { %v1302_v32 = vpop.f32.mrb[8].mxu0  ;;  %1591 = vmatpush3.bf16.msra.mxu1 %v1588_v51 }
 0x1a1   : > { %v441_v33 = vpop.f32.mrb[9].mxu0  ;;  %1593 = vmatprep.subr.bf16.mxu1 %v1592_v54 }
 0x1a2   : > { %1356 = vmatprep.mubr.f32.mxu1 %v441_v33 }
 0x1a3   : > { %1357 = vmatmul.mubr.f32.gmra.mrb[8].mxu1 %v1302_v32 }
 0x1a4   : > { %v1305_v34 = vpop.f32.mrb[10].mxu0  ;;  %1595 = vmatpush3.bf16.msra.mxu1 %v1592_v54 }
 0x1a5   : > { %v451_v35 = vpop.f32.mrb[11].mxu0  ;;  %1597 = vmatprep.subr.bf16.mxu1 %v1596_v57 }
 0x1a6   : > { %1359 = vmatprep.mubr.f32.mxu1 %v451_v35 }
 0x1a7   : > { %1360 = vmatmul.mubr.f32.gmra.mrb[10].mxu1 %v1305_v34 }
 0x1a8   : > { %v1308_v36 = vpop.f32.mrb[12].mxu0  ;;  %1599 = vmatpush3.bf16.msra.mxu1 %v1596_v57 }
 0x1a9   : > { %v461_v37 = vpop.f32.mrb[13].mxu0  ;;  %1601 = vmatprep.subr.bf16.mxu1 %v1600_v60 }
 0x1aa   : > { %1362 = vmatprep.mubr.f32.mxu1 %v461_v37 }
 0x1ab   : > { %1363 = vmatmul.mubr.f32.gmra.mrb[12].mxu1 %v1308_v36 }
 0x1ac   : > { %v1311_v38 = vpop.f32.mrb[14].mxu0  ;;  %1603 = vmatpush3.bf16.msra.mxu1 %v1600_v60 }
 0x1ad   : > { %v471_v39 = vpop.f32.mrb[15].mxu0  ;;  %1605 = vmatprep.subr.bf16.mxu1 %v1604_v63 }
 0x1ae   : > { %1365 = vmatprep.mubr.f32.mxu1 %v471_v39 }
 0x1af   : > { %1366 = vmatmul.mubr.f32.gmra.mrb[14].mxu1 %v1311_v38 }
 0x1b0   : > { %1607 = vmatpush3.bf16.msra.mxu1 %v1604_v63 }
 0x266   : > { %v1346_v0 = vpop.f32.mrb[0].mxu1 }
 0x267   : > { %v562_v1 = vpop.f32.mrb[1].mxu1 }
 0x268   : > { %1400 = vmatprep.mubr.f32.mxu0 %v562_v1 }
 0x269   : > { %1401 = vmatmul.mubr.f32.vlgmr.msra.gmra.mrb[16].mxu0 %v1346_v0 }
 0x26a   : > { %v1349_v2 = vpop.f32.mrb[2].mxu1 }
 0x26b   : > { %v572_v3 = vpop.f32.mrb[3].mxu1 }
 0x26c   : > { %1403 = vmatprep.mubr.f32.mxu0 %v572_v3 }
 0x26d   : > { %1404 = vmatmul.mubr.f32.gmra.mrb[18].mxu0 %v1349_v2 }
 0x26e   : > { %v1352_v4 = vpop.f32.mrb[4].mxu1 }
 0x26f   : > { %v582_v5 = vpop.f32.mrb[5].mxu1 }
 0x270   : > { %1406 = vmatprep.mubr.f32.mxu0 %v582_v5 }
 0x271   : > { %1407 = vmatmul.mubr.f32.gmra.mrb[20].mxu0 %v1352_v4 }
 0x272   : > { %v1355_v6 = vpop.f32.mrb[6].mxu1 }
 0x273   : > { %v592_v7 = vpop.f32.mrb[7].mxu1 }
 0x274   : > { %1409 = vmatprep.mubr.f32.mxu0 %v592_v7 }
 0x275   : > { %1410 = vmatmul.mubr.f32.gmra.mrb[22].mxu0 %v1355_v6 }
 0x276   : > { %v1358_v8 = vpop.f32.mrb[8].mxu1 }
 0x277   : > { %v602_v9 = vpop.f32.mrb[9].mxu1 }
 0x278   : > { %1412 = vmatprep.mubr.f32.mxu0 %v602_v9 }
 0x279   : > { %1413 = vmatmul.mubr.f32.gmra.mrb[24].mxu0 %v1358_v8 }
 0x27a   : > { %v1361_v10 = vpop.f32.mrb[10].mxu1 }
 0x27b   : > { %v612_v11 = vpop.f32.mrb[11].mxu1 }
 0x27c   : > { %1415 = vmatprep.mubr.f32.mxu0 %v612_v11 }
 0x27d   : > { %1416 = vmatmul.mubr.f32.gmra.mrb[26].mxu0 %v1361_v10 }
 0x27e   : > { %v1364_v12 = vpop.f32.mrb[12].mxu1 }
 0x27f   : > { %v622_v13 = vpop.f32.mrb[13].mxu1 }
 0x280   : > { %1418 = vmatprep.mubr.f32.mxu0 %v622_v13 }
 0x281   : > { %1419 = vmatmul.mubr.f32.gmra.mrb[28].mxu0 %v1364_v12 }
 0x282   : > { %v1367_v14 = vpop.f32.mrb[14].mxu1 }
 0x283   : > { %v632_v15 = vpop.f32.mrb[15].mxu1 }
 0x284   : > { %1421 = vmatprep.mubr.f32.mxu0 %v632_v15 }
 0x285   : > { %1422 = vmatmul.mubr.f32.gmra.mrb[30].mxu0 %v1367_v14 }
 0x33c   : > { %v1402_v16 = vpop.f32.mrb[16].mxu0 }
 0x33d   : > { %v723_v17 = vpop.f32.mrb[17].mxu0 }
 0x33e   : > { %1456 = vmatprep.mubr.f32.mxu1 %v723_v17 }
 0x33f   : > { %1457 = vmatmul.mubr.f32.vlgmr.msra.gmra.mrb[16].mxu1 %v1402_v16 }
 0x340   : > { %v1405_v18 = vpop.f32.mrb[18].mxu0 }
 0x341   : > { %v733_v19 = vpop.f32.mrb[19].mxu0 }
 0x342   : > { %1459 = vmatprep.mubr.f32.mxu1 %v733_v19 }
 0x343   : > { %1460 = vmatmul.mubr.f32.gmra.mrb[18].mxu1 %v1405_v18 }
 0x344   : > { %v1408_v20 = vpop.f32.mrb[20].mxu0 }
 0x345   : > { %v743_v21 = vpop.f32.mrb[21].mxu0 }
 0x346   : > { %1462 = vmatprep.mubr.f32.mxu1 %v743_v21 }
 0x347   : > { %1463 = vmatmul.mubr.f32.gmra.mrb[20].mxu1 %v1408_v20 }
 0x348   : > { %v1411_v22 = vpop.f32.mrb[22].mxu0 }
 0x349   : > { %v753_v23 = vpop.f32.mrb[23].mxu0 }
 0x34a   : > { %1465 = vmatprep.mubr.f32.mxu1 %v753_v23 }
 0x34b   : > { %1466 = vmatmul.mubr.f32.gmra.mrb[22].mxu1 %v1411_v22 }
 0x34c   : > { %v1414_v24 = vpop.f32.mrb[24].mxu0 }
 0x34d   : > { %v763_v25 = vpop.f32.mrb[25].mxu0 }
 0x34e   : > { %1468 = vmatprep.mubr.f32.mxu1 %v763_v25 }
 0x34f   : > { %1469 = vmatmul.mubr.f32.gmra.mrb[24].mxu1 %v1414_v24 }
 0x350   : > { %v1417_v26 = vpop.f32.mrb[26].mxu0 }
 0x351   : > { %v773_v27 = vpop.f32.mrb[27].mxu0 }
 0x352   : > { %1471 = vmatprep.mubr.f32.mxu1 %v773_v27 }
 0x353   : > { %1472 = vmatmul.mubr.f32.gmra.mrb[26].mxu1 %v1417_v26 }
 0x354   : > { %v1420_v28 = vpop.f32.mrb[28].mxu0 }
 0x355   : > { %v783_v29 = vpop.f32.mrb[29].mxu0 }
 0x356   : > { %1474 = vmatprep.mubr.f32.mxu1 %v783_v29 }
 0x357   : > { %1475 = vmatmul.mubr.f32.gmra.mrb[28].mxu1 %v1420_v28 }
 0x358   : > { %v1423_v30 = vpop.f32.mrb[30].mxu0 }
 0x359   : > { %v793_v31 = vpop.f32.mrb[31].mxu0 }
 0x35a   : > { %1477 = vmatprep.mubr.f32.mxu1 %v793_v31 }
 0x35b   : > { %1478 = vmatmul.mubr.f32.gmra.mrb[30].mxu1 %v1423_v30 }
 0x412   : > { %v1458_v32 = vpop.f32.mrb[16].mxu1 }
 0x413   : > { %964 = vst [vmem:[%s2221_s24 + $0x8] sm:$0xff] %v1458_v32  ;;  %v884_v33 = vpop.f32.mrb[17].mxu1 }
 0x414   : > { %963 = vst [vmem:[%s2221_s24] sm:$0xff] %v884_v33 }
 0x416   : > { %v1461_v34 = vpop.f32.mrb[18].mxu1 }
 0x417   : > { %966 = vst [vmem:[%s2221_s24 + $0x18] sm:$0xff] %v1461_v34  ;;  %v894_v35 = vpop.f32.mrb[19].mxu1 }
 0x418   : > { %965 = vst [vmem:[%s2221_s24 + $0x10] sm:$0xff] %v894_v35 }
 0x41a   : > { %v1464_v36 = vpop.f32.mrb[20].mxu1 }
 0x41b   : > { %968 = vst [vmem:[%s2221_s24 + $0x28] sm:$0xff] %v1464_v36  ;;  %v904_v37 = vpop.f32.mrb[21].mxu1 }
 0x41c   : > { %967 = vst [vmem:[%s2221_s24 + $0x20] sm:$0xff] %v904_v37 }
 0x41e   : > { %v1467_v38 = vpop.f32.mrb[22].mxu1 }
 0x41f   : > { %970 = vst [vmem:[%s2221_s24 + $0x38] sm:$0xff] %v1467_v38  ;;  %v914_v39 = vpop.f32.mrb[23].mxu1 }
 0x420   : > { %969 = vst [vmem:[%s2221_s24 + $0x30] sm:$0xff] %v914_v39 }
 0x422   : > { %v1470_v40 = vpop.f32.mrb[24].mxu1 }
 0x423   : > { %972 = vst [vmem:[%s2221_s24 + $0x48] sm:$0xff] %v1470_v40  ;;  %v924_v41 = vpop.f32.mrb[25].mxu1 }
 0x424   : > { %971 = vst [vmem:[%s2221_s24 + $0x40] sm:$0xff] %v924_v41 }
 0x426   : > { %v1473_v42 = vpop.f32.mrb[26].mxu1 }
 0x427   : > { %974 = vst [vmem:[%s2221_s24 + $0x58] sm:$0xff] %v1473_v42  ;;  %v934_v43 = vpop.f32.mrb[27].mxu1 }
 0x428   : > { %973 = vst [vmem:[%s2221_s24 + $0x50] sm:$0xff] %v934_v43 }
 0x42a   : > { %v1476_v44 = vpop.f32.mrb[28].mxu1 }
 0x42b   : > { %976 = vst [vmem:[%s2221_s24 + $0x68] sm:$0xff] %v1476_v44  ;;  %v944_v45 = vpop.f32.mrb[29].mxu1 }
 0x42c   : > { %975 = vst [vmem:[%s2221_s24 + $0x60] sm:$0xff] %v944_v45 }
 0x42e   : > { %v1479_v46 = vpop.f32.mrb[30].mxu1 }
 0x42f   : > { %978 = vst [vmem:[%s2221_s24 + $0x78] sm:$0xff] %v1479_v46  ;;  %v954_v47 = vpop.f32.mrb[31].mxu1 }
 0x430   : > { %977 = vst [vmem:[%s2221_s24 + $0x70] sm:$0xff] %v954_v47 }
 0x431   : > { %1854 = shalt.err (!%p1851_p13)
}
 0x432   : > { %s1855_s28 = scalar_lea.hbm %s2242_s8, 2048  ;;  %s1859_s11 = scalar_lea.hbm %s2295_s5, 4096 }
 0x433   : > { %p1856_p9 = scmp.ne.s32.totalorder %s2242_s8, %s1855_s28  ;;  %p1860_p4 = scmp.lt.u32.totalorder %s2242_s8, %s2295_s5 }
 0x434   : > { %p1861_p8 = scmp.lt.u32.totalorder %s1859_s11, %s1855_s28  ;;  %p1863_p3 = scmp.lt.u32.totalorder %s1855_s28, %s2242_s8 }
 0x435   : > { %p1857_p0 = pnand %p1856_p9, %p2128_p10 }
 0x436   : > { %p1862_p6 = por %p1861_p8, %p1860_p4 }
 0x437   : > { %p1858_p11 = pneg %p1857_p0 }
 0x438   : > { %p1864_p5 = por %p1863_p3, %p1862_p6 }
 0x43a   : > { %p1865_p7 = pnand %p1864_p5, %p1858_p11 }
 0x43c   : > { %1868 = shalt.err (!%p1865_p7)
}
 0x43d   : > { %s1925_s26 = smov 128   ;;  %s1926_s27 = smov 8  }
 0x43e   : > { %1626 = dma.vmem_to_hbm [thread:$0]  (%p2128_p10), %s2244_s23, 2048, %s2242_s8, %s980_s6, %s1925_s26, %s1925_s26, %s1926_s27  }
 0x43f PF: > { %s1008_s13 = sand.u32 1, %s1903_s18   ;;  %p2313_p12 = scmp.ne.s32.totalorder %s2300_s25, 0 }
 0x440   : > { %p2314_p1 = scmp.ge.s32.totalorder %s1915_s21, 2  ;;  %s1009_s22 = scalar_lea.sflag [#allocation4], %s1008_s13 }
 0x442   : > { %p1646_p2 = pnand %p2314_p1, %p2313_p12 }
 0x444   : > { %1898 = dma.done.wait (!%p1646_p2), %s1009_s22, 2048  }
 0x445   : > { %1900 = vsyncadd (!%p1646_p2), %s1009_s22, 4294965248  ;;  %p20_p13 = scmp.ge.s32.totalorder %s2118_s14, 4   ;;  %s2315_s18 = smov %s1907_s19 }
 0x446   : > { %s2316_s19 = smov %s1911_s20  ;;  %s2317_s20 = smov %s2134_s7 }
 0x447   : > { %s2318_s21 = smov %s2118_s14  ;;  %22 = sbr.rel (!%p20_p13) target bundleno = 7 (0x7), region = 101 }
 0x44e   :  { %1014 = vsyncpa [#allocation3], 1 }
 0x44f   :  { %1016 = vsyncpa [#allocation3 + $0x1], 1 }
 0x450   :  { %1017 = vsyncpa [#allocation6], 1 }
 0x451   :  { %1018 = vsyncpa [#allocation9], 1 }
 0x452   :  { %1019 = vsyncpa [#allocation4], 1 }
 0x453   :  { %1021 = vsyncpa [#allocation4 + $0x1], 1 }

</bundles_post_ra>
